<compile_context>
chip_gen: v6e
topology: v6e:2x2x1
jax: 0.10.0
libtpu: 0.0.40
codegen_flags: <defaults>
</compile_context>

<pallas_src>
import functools

import jax
import jax.numpy as jnp
from jax.experimental import pallas as pl
from jax.experimental.pallas import tpu as pltpu

LANE = 128
_VMEM_LIMIT = 32 * 1024 * 1024   # safe on v5e/v6e and under v7x's 64 MiB physical


def _round_up(x, m):
    return (x + m - 1) // m * m


def _cdiv(a, b):
    return -(-a // b)


def avg_pool_nhwc(x, k):
    B, H, W, C = x.shape
    return x.reshape(B, H // k, k, W // k, k, C).mean(axis=(2, 4))


def _stable_sigmoid(x):
    # numerically stable sigmoid via a single EUP tanh
    return 0.5 * (jnp.tanh(0.5 * x) + 1.0)


def _divmod_exact(n, d):
    """Exact floor-div / mod of non-negative integers carried in f32.

    Exact for n < 2**24 (row ids within one level easily satisfy this); the
    +-1 correction repairs any rounding of the f32 division.
    """
    q = jnp.floor(n / d)
    r = n - q * d
    q = q + jnp.where(r >= d, 1.0, 0.0) - jnp.where(r < 0.0, 1.0, 0.0)
    r = n - q * d
    return q, r


# ----------------------------------------------------------------------------
# Fused stem + head + bbox-decode kernel (one launch for all levels)
# ----------------------------------------------------------------------------
def _fused_stem_head_kernel(lvl_ref, rb_ref, wdim_ref, hw_ref, stride_ref,
                            x_ref, ws_ref, bs_ref, wh_ref, bh_ref, o_ref,
                            *, tm, nc, idx_col):
    """x: [tm, cin_pad] bf16, ws: [cin_pad, feat_pad] bf16, wh: [feat_pad, head_pad] bf16.

    Output slab o: [tm, head_pad] f32 with lane-packed columns
      [0, nc)               : cls scores
      [nc, nc+4)            : DECODED bbox (x_c, y_c, w, h)
      [nc+4, idx_col)       : mask kernels | mask feats
      [idx_col, idx_col+3)  : (level, y_idx, x_idx)
    """
    i = pl.program_id(0)

    # ---- stem 1x1 conv + bias + ReLU (feature map never leaves VMEM) ----
    feat = jnp.dot(x_ref[...], ws_ref[...], preferred_element_type=jnp.float32)
    feat = jnp.maximum(feat + bs_ref[...], 0.0).astype(jnp.bfloat16)

    # ---- fused head projection (cls | reg | mask-kernels | mask-feats) ----
    acc = jnp.dot(feat, wh_ref[...], preferred_element_type=jnp.float32)
    acc = acc + bh_ref[...]

    # ---- per-tile scalars from SMEM (scalar prefetch) ----
    lvl_f = lvl_ref[i].astype(jnp.float32)
    row0 = rb_ref[i].astype(jnp.float32)
    w_dim = wdim_ref[i].astype(jnp.float32)
    hw = hw_ref[i].astype(jnp.float32)
    stride = stride_ref[i].astype(jnp.float32)

    # ---- (row -> y, x) grid position; exact integer math carried in f32 ----
    rows = row0 + jax.lax.broadcasted_iota(jnp.int32, (tm, 1), 0).astype(jnp.float32)
    _, rem = _divmod_exact(rows, hw)          # position within one feature map
    y_idx, x_idx = _divmod_exact(rem, w_dim)

    # ---- bbox decode (RTMDETModel._decode_bbox_outputs), stride is per-tile ----
    x_off = _stable_sigmoid(acc[:, nc:nc + 1])
    y_off = _stable_sigmoid(acc[:, nc + 1:nc + 2])
    w_box = jnp.exp(acc[:, nc + 2:nc + 3]) * stride
    h_box = jnp.exp(acc[:, nc + 3:nc + 4]) * stride
    x_c = (x_idx + x_off) * stride
    y_c = (y_idx + y_off) * stride
    lvl_col = jnp.zeros((tm, 1), jnp.float32) + lvl_f

    # ---- one unmasked full-slab store + two narrow column-group stores ----
    o_ref[...] = acc
    o_ref[:, nc:nc + 4] = jnp.concatenate([x_c, y_c, w_box, h_box], axis=1)
    o_ref[:, idx_col:idx_col + 3] = jnp.concatenate([lvl_col, y_idx, x_idx], axis=1)


def fused_stem_head(pooled_feats, params, *, num_classes, num_kernels, mask_ch,
                    tm=1024):
    """Single merged launch over all pyramid levels (row-concatenated)."""
    cin_pad = params["stem_w"].shape[1]
    feat_pad = params["stem_w"].shape[2]
    head_pad = params["head_w"].shape[1]
    nc = num_classes
    idx_col = nc + 4 + num_kernels + mask_ch

    max_n = max(int(p.shape[0] * p.shape[1] * p.shape[2]) for p in pooled_feats)
    tm = max(8, min(tm, _round_up(max_n, 8)))          # keep tiles a multiple of 8 rows

    x_rows, segs = [], []
    lvl_l, rb_l, w_l, hw_l, st_l = [], [], [], [], []
    cursor = 0
    for li, p in enumerate(pooled_feats):
        B, H, W, C = p.shape
        n_l = B * H * W
        n_tiles = _cdiv(n_l, tm)                       # level boundaries tile-aligned
        n_pad = n_tiles * tm
        xl = p.reshape(n_l, C)
        xl = jnp.pad(xl, ((0, n_pad - n_l), (0, cin_pad - C)))
        x_rows.append(xl)
        segs.append((cursor, n_l, B, H, W))
        for t in range(n_tiles):
            lvl_l.append(li)
            rb_l.append(t * tm)
            w_l.append(W)
            hw_l.append(H * W)
            st_l.append(2 ** (3 + li))
        cursor += n_pad

    # TODO(synk): the [tm, cin_pad] input operand is lane-sparse for the tiny
    # 3-channel stand-in stem; irrelevant once a real backbone feeds this kernel.
    x_all = jnp.concatenate(x_rows, axis=0).astype(jnp.bfloat16)
    num_tiles = len(lvl_l)

    kern = functools.partial(_fused_stem_head_kernel, tm=tm, nc=nc, idx_col=idx_col)
    out = pl.pallas_call(
        kern,
        out_shape=jax.ShapeDtypeStruct((cursor, head_pad), jnp.float32),
        grid_spec=pltpu.PrefetchScalarGridSpec(
            num_scalar_prefetch=5,
            grid=(num_tiles,),
            in_specs=[
                pl.BlockSpec((tm, cin_pad), lambda i, *_: (i, 0)),
                # per-tile level selects the stem weight / bias block
                pl.BlockSpec((None, cin_pad, feat_pad),
                             lambda i, lvl, *_: (lvl[i], 0, 0)),
                pl.BlockSpec((None, 1, feat_pad),
                             lambda i, lvl, *_: (lvl[i], 0, 0)),
                pl.BlockSpec((feat_pad, head_pad), lambda i, *_: (0, 0)),  # resident
                pl.BlockSpec((1, head_pad), lambda i, *_: (0, 0)),
            ],
            out_specs=pl.BlockSpec((tm, head_pad), lambda i, *_: (i, 0)),
        ),
        compiler_params=pltpu.CompilerParams(
            dimension_semantics=("parallel",),     # rows independent -> megacore on v7x
            vmem_limit_bytes=_VMEM_LIMIT,
        ),
    )(jnp.asarray(lvl_l, jnp.int32),
      jnp.asarray(rb_l, jnp.int32),
      jnp.asarray(w_l, jnp.int32),
      jnp.asarray(hw_l, jnp.int32),
      jnp.asarray(st_l, jnp.int32),
      x_all, params["stem_w"], params["stem_b"], params["head_w"], params["head_b"])
    return out, segs, idx_col


# ----------------------------------------------------------------------------
# Parameters & forward glue
# ----------------------------------------------------------------------------
def init_params(in_ch, feat_ch, num_classes, num_kernels, mask_ch):
    key = jax.random.PRNGKey(42)
    ks = jax.random.split(key, 12)
    cin_pad = _round_up(max(in_ch, 8), 8)
    feat_pad = _round_up(feat_ch, LANE)                 # lane-dense stem Cout
    head_cols = num_classes + 4 + num_kernels + mask_ch
    head_pad = _round_up(head_cols + 3, LANE)           # + 3 index columns

    stem_w, stem_b = [], []
    for li in range(3):
        w = 0.1 * jax.random.normal(ks[li], (in_ch, feat_ch), jnp.float32)
        stem_w.append(jnp.pad(w, ((0, cin_pad - in_ch), (0, feat_pad - feat_ch))))
        b = 0.05 * jax.random.normal(ks[3 + li], (feat_ch,), jnp.float32)
        stem_b.append(jnp.pad(b, (0, feat_pad - feat_ch)))

    cls_w = 0.1 * jax.random.normal(ks[6], (feat_ch, num_classes), jnp.float32)
    reg_w = 0.1 * jax.random.normal(ks[7], (feat_ch, 4), jnp.float32)
    krn_w = 0.1 * jax.random.normal(ks[8], (feat_ch, num_kernels), jnp.float32)
    mft_w = 0.1 * jax.random.normal(ks[9], (feat_ch, mask_ch), jnp.float32)
    head_w = jnp.concatenate([cls_w, reg_w, krn_w, mft_w], axis=1)
    head_b = 0.05 * jax.random.normal(ks[10], (head_cols,), jnp.float32)
    head_w = jnp.pad(head_w, ((0, feat_pad - feat_ch), (0, head_pad - head_cols)))
    head_b = jnp.pad(head_b, (0, head_pad - head_cols))

    return {
        "stem_w": jnp.stack(stem_w).astype(jnp.bfloat16),      # [3, cin_pad, feat_pad]
        "stem_b": jnp.stack(stem_b).reshape(3, 1, feat_pad),   # [3, 1, feat_pad] f32
        "head_w": head_w.astype(jnp.bfloat16),                 # [feat_pad, head_pad]
        "head_b": head_b.reshape(1, head_pad),                 # [1, head_pad] f32
    }


def rtmdet_forward(x_nchw, params, *, num_classes, num_kernels, mask_ch, tm=1024):
    x = jnp.transpose(x_nchw, (0, 2, 3, 1)).astype(jnp.float32)  # NCHW -> NHWC

    # TODO(synk): RTMDETBackbone / PAFPN / RTMDetHead conv stacks are not in the
    # provided source; avg-pool stems stand in for p3/p4/p5 (strides 8/16/32).
    pooled = [avg_pool_nhwc(x, k) for k in (8, 16, 32)]

    out, segs, idx_col = fused_stem_head(
        pooled, params, num_classes=num_classes, num_kernels=num_kernels,
        mask_ch=mask_ch, tm=tm)

    nc = num_classes
    head_pad = out.shape[1]
    cls_l, box_l, idx_l, mask_outs = [], [], [], []
    for (start, n_l, B, H, W) in segs:
        seg = out[start:start + n_l].reshape(B, H * W, head_pad)
        cls_l.append(seg[..., :nc])                           # cls scores
        box_l.append(seg[..., nc:nc + 4])                     # DECODED bboxes
        idx_l.append(seg[..., idx_col:idx_col + 3])           # (level, y, x)
        mkr = seg[..., nc + 4:nc + 4 + num_kernels]
        mft = seg[..., nc + 4 + num_kernels:idx_col].reshape(B, H, W, mask_ch)
        mask_outs.extend([mkr, mft])

    cls_scores = jnp.concatenate(cls_l, axis=1)     # [B, P, num_classes]
    bbox_decoded = jnp.concatenate(box_l, axis=1)   # [B, P, 4]
    indices = jnp.concatenate(idx_l, axis=1)        # [B, P, 3]
    return (cls_scores, bbox_decoded, indices, *mask_outs)


if __name__ == "__main__":
    B, in_ch, img_size = 2, 3, 64
    num_classes, feat_ch, num_kernels, mask_ch = 4, 16, 8, 8

    key = jax.random.PRNGKey(0)
    x = jax.random.normal(key, (B, in_ch, img_size, img_size), jnp.float32)  # NCHW

    params = init_params(in_ch, feat_ch, num_classes, num_kernels, mask_ch)

    fwd = jax.jit(functools.partial(rtmdet_forward, num_classes=num_classes,
                                    num_kernels=num_kernels, mask_ch=mask_ch))
    outs = jax.block_until_ready(fwd(x, params))

    cls_scores, bbox_decoded, indices = outs[0], outs[1], outs[2]
    assert cls_scores.ndim == bbox_decoded.ndim == indices.ndim == 3
    assert cls_scores.shape[1] == bbox_decoded.shape[1] == indices.shape[1]
    assert bbox_decoded.shape == (B, cls_scores.shape[1], 4)
    assert len(outs) == 9

    # Pure-JAX reference (same bf16-quantized inputs) of the specified compute.
    def reference_forward(x_nchw):
        xh = jnp.transpose(x_nchw, (0, 2, 3, 1)).astype(jnp.float32)
        cin_pad = params["stem_w"].shape[1]
        cls_l, box_l, idx_l = [], [], []
        for li, k in enumerate((8, 16, 32)):
            pooled = avg_pool_nhwc(xh, k)
            Bn, H, W, C = pooled.shape
            xp = jnp.pad(pooled.reshape(-1, C), ((0, 0), (0, cin_pad - C)))
            xp = xp.astype(jnp.bfloat16).astype(jnp.float32)
            ws = params["stem_w"][li].astype(jnp.float32)
            bs = params["stem_b"][li, 0]
            f = jnp.maximum(xp @ ws + bs[None, :], 0.0)
            f = f.astype(jnp.bfloat16).astype(jnp.float32)
            hd = f @ params["head_w"].astype(jnp.float32) + params["head_b"]
            hd = hd.reshape(Bn, H * W, -1)
            cls_l.append(hd[..., :num_classes])
            reg = hd[..., num_classes:num_classes + 4]
            ys, xs = jnp.meshgrid(jnp.arange(H), jnp.arange(W), indexing="ij")
            idx = jnp.stack([jnp.full((H, W), float(li), jnp.float32),
                             ys.astype(jnp.float32), xs.astype(jnp.float32)],
                            axis=-1).reshape(1, H * W, 3)
            idx = jnp.broadcast_to(idx, (Bn, H * W, 3))
            stride = 2.0 ** (3 + li)
            xc = (idx[..., 2] + jax.nn.sigmoid(reg[..., 0])) * stride
            yc = (idx[..., 1] + jax.nn.sigmoid(reg[..., 1])) * stride
            wv = jnp.exp(reg[..., 2]) * stride
            hv = jnp.exp(reg[..., 3]) * stride
            box_l.append(jnp.stack([xc, yc, wv, hv], axis=-1))
            idx_l.append(idx)
        return (jnp.concatenate(cls_l, 1), jnp.concatenate(box_l, 1),
                jnp.concatenate(idx_l, 1))

    ref_cls, ref_box, ref_idx = reference_forward(x)
    assert bool(jnp.allclose(cls_scores, ref_cls, rtol=2e-2, atol=2e-2))
    assert bool(jnp.allclose(bbox_decoded, ref_box, rtol=2e-2, atol=2e-2))
    assert bool(jnp.allclose(indices, ref_idx, rtol=0, atol=1e-5))

    print("KERNEL_OK")
</pallas_src>

<mosaic_0001>
module attributes {stable_mosaic.version = 11 : i64} {
  func.func @_fused_stem_head_kernel(%arg0: i32, %arg1: memref<3xi32, #tpu.memory_space<smem>>, %arg2: memref<3xi32, #tpu.memory_space<smem>>, %arg3: memref<3xi32, #tpu.memory_space<smem>>, %arg4: memref<3xi32, #tpu.memory_space<smem>>, %arg5: memref<3xi32, #tpu.memory_space<smem>>, %arg6: memref<128x8xbf16, #tpu.memory_space<vmem>>, %arg7: memref<1x8x128xbf16, #tpu.memory_space<vmem>>, %arg8: memref<1x1x128xf32, #tpu.memory_space<vmem>>, %arg9: memref<128x128xbf16, #tpu.memory_space<vmem>>, %arg10: memref<1x128xf32, #tpu.memory_space<vmem>>, %arg11: memref<128x128xf32, #tpu.memory_space<vmem>>) attributes {dimension_semantics = [#tpu.dimension_semantics<parallel>], iteration_bounds = array<i64: 3>, scalar_prefetch = 5 : i64, scratch_operands = 0 : i64, tpu.core_type = #tpu.core_type<tc>, window_params = [{transform_indices = @transform_0, window_bounds = array<i64: 128, 8>}, {transform_indices = @transform_1, window_bounds = array<i64: 1, 8, 128>}, {transform_indices = @transform_2, window_bounds = array<i64: 1, 1, 128>}, {pipeline_mode = #tpu.pipeline_mode<synchronous>, transform_indices = @transform_3, window_bounds = array<i64: 128, 128>}, {pipeline_mode = #tpu.pipeline_mode<synchronous>, transform_indices = @transform_4, window_bounds = array<i64: 1, 128>}, {transform_indices = @transform_5, window_bounds = array<i64: 128, 128>}]} {
    %c0 = arith.constant 0 : index
    %c0_0 = arith.constant 0 : index
    %0 = vector.load %arg6[%c0, %c0_0] : memref<128x8xbf16, #tpu.memory_space<vmem>>, vector<128x8xbf16>
    %c0_1 = arith.constant 0 : index
    %c0_2 = arith.constant 0 : index
    %c0_3 = arith.constant 0 : index
    %1 = vector.load %arg7[%c0_1, %c0_2, %c0_3] : memref<1x8x128xbf16, #tpu.memory_space<vmem>>, vector<1x8x128xbf16>
    %2 = vector.shape_cast %1 : vector<1x8x128xbf16> to vector<8x128xbf16>
    %cst = arith.constant dense<0.000000e+00> : vector<128x128xf32>
    %3 = tpu.matmul %0, %2, %cst {dimension_numbers = #tpu.dot_dimension_numbers<[1], [0], [0], [1], [0, 0, 1, 1], [], []>} : vector<128x8xbf16>, vector<8x128xbf16>, vector<128x128xf32> -> vector<128x128xf32>
    %c0_4 = arith.constant 0 : index
    %c0_5 = arith.constant 0 : index
    %c0_6 = arith.constant 0 : index
    %4 = vector.load %arg8[%c0_4, %c0_5, %c0_6] : memref<1x1x128xf32, #tpu.memory_space<vmem>>, vector<1x1x128xf32>
    %5 = vector.shape_cast %4 : vector<1x1x128xf32> to vector<1x128xf32>
    %6 = vector.broadcast %5 : vector<1x128xf32> to vector<128x128xf32>
    %7 = arith.addf %3, %6 : vector<128x128xf32>
    %cst_7 = arith.constant 0.000000e+00 : f32
    %8 = vector.broadcast %cst_7 : f32 to vector<128x128xf32>
    %9 = arith.maximumf %7, %8 : vector<128x128xf32>
    %10 = arith.truncf %9 : vector<128x128xf32> to vector<128x128xbf16>
    %c0_8 = arith.constant 0 : index
    %c0_9 = arith.constant 0 : index
    %11 = vector.load %arg9[%c0_8, %c0_9] : memref<128x128xbf16, #tpu.memory_space<vmem>>, vector<128x128xbf16>
    %cst_10 = arith.constant dense<0.000000e+00> : vector<128x128xf32>
    %12 = tpu.matmul %10, %11, %cst_10 {dimension_numbers = #tpu.dot_dimension_numbers<[1], [0], [0], [1], [0, 0, 1, 1], [], []>} : vector<128x128xbf16>, vector<128x128xbf16>, vector<128x128xf32> -> vector<128x128xf32>
    %c0_11 = arith.constant 0 : index
    %c0_12 = arith.constant 0 : index
    %13 = vector.load %arg10[%c0_11, %c0_12] : memref<1x128xf32, #tpu.memory_space<vmem>>, vector<1x128xf32>
    %14 = vector.broadcast %13 : vector<1x128xf32> to vector<128x128xf32>
    %15 = arith.addf %12, %14 : vector<128x128xf32>
    %16 = arith.index_cast %arg0 : i32 to index
    %17 = memref.load %arg1[%16] : memref<3xi32, #tpu.memory_space<smem>>
    %18 = arith.sitofp %17 : i32 to f32
    %19 = arith.index_cast %arg0 : i32 to index
    %20 = memref.load %arg2[%19] : memref<3xi32, #tpu.memory_space<smem>>
    %21 = arith.sitofp %20 : i32 to f32
    %22 = arith.index_cast %arg0 : i32 to index
    %23 = memref.load %arg3[%22] : memref<3xi32, #tpu.memory_space<smem>>
    %24 = arith.sitofp %23 : i32 to f32
    %25 = arith.index_cast %arg0 : i32 to index
    %26 = memref.load %arg4[%25] : memref<3xi32, #tpu.memory_space<smem>>
    %27 = arith.sitofp %26 : i32 to f32
    %28 = arith.index_cast %arg0 : i32 to index
    %29 = memref.load %arg5[%28] : memref<3xi32, #tpu.memory_space<smem>>
    %30 = arith.sitofp %29 : i32 to f32
    %31 = tpu.iota {dimensions = array<i32: 0>} : vector<128x1xi32>
    %32 = arith.sitofp %31 : vector<128x1xi32> to vector<128x1xf32>
    %33 = vector.broadcast %21 : f32 to vector<128x1xf32>
    %34 = arith.addf %33, %32 : vector<128x1xf32>
    %35 = vector.broadcast %27 : f32 to vector<128x1xf32>
    %36 = arith.divf %34, %35 : vector<128x1xf32>
    %37 = math.floor %36 : vector<128x1xf32>
    %38 = vector.broadcast %27 : f32 to vector<128x1xf32>
    %39 = arith.mulf %37, %38 : vector<128x1xf32>
    %40 = arith.subf %34, %39 : vector<128x1xf32>
    %41 = vector.broadcast %27 : f32 to vector<128x1xf32>
    %42 = arith.cmpf oge, %40, %41 : vector<128x1xf32>
    %cst_13 = arith.constant 1.000000e+00 : f32
    %cst_14 = arith.constant 0.000000e+00 : f32
    %43 = vector.broadcast %cst_13 : f32 to vector<128x1xf32>
    %44 = vector.broadcast %cst_14 : f32 to vector<128x1xf32>
    %45 = arith.select %42, %43, %44 : vector<128x1xi1>, vector<128x1xf32>
    %46 = arith.addf %37, %45 : vector<128x1xf32>
    %cst_15 = arith.constant 0.000000e+00 : f32
    %47 = vector.broadcast %cst_15 : f32 to vector<128x1xf32>
    %48 = arith.cmpf olt, %40, %47 : vector<128x1xf32>
    %cst_16 = arith.constant 1.000000e+00 : f32
    %cst_17 = arith.constant 0.000000e+00 : f32
    %49 = vector.broadcast %cst_16 : f32 to vector<128x1xf32>
    %50 = vector.broadcast %cst_17 : f32 to vector<128x1xf32>
    %51 = arith.select %48, %49, %50 : vector<128x1xi1>, vector<128x1xf32>
    %52 = arith.subf %46, %51 : vector<128x1xf32>
    %53 = vector.broadcast %27 : f32 to vector<128x1xf32>
    %54 = arith.mulf %52, %53 : vector<128x1xf32>
    %55 = arith.subf %34, %54 : vector<128x1xf32>
    %56 = vector.broadcast %24 : f32 to vector<128x1xf32>
    %57 = arith.divf %55, %56 : vector<128x1xf32>
    %58 = math.floor %57 : vector<128x1xf32>
    %59 = vector.broadcast %24 : f32 to vector<128x1xf32>
    %60 = arith.mulf %58, %59 : vector<128x1xf32>
    %61 = arith.subf %55, %60 : vector<128x1xf32>
    %62 = vector.broadcast %24 : f32 to vector<128x1xf32>
    %63 = arith.cmpf oge, %61, %62 : vector<128x1xf32>
    %cst_18 = arith.constant 1.000000e+00 : f32
    %cst_19 = arith.constant 0.000000e+00 : f32
    %64 = vector.broadcast %cst_18 : f32 to vector<128x1xf32>
    %65 = vector.broadcast %cst_19 : f32 to vector<128x1xf32>
    %66 = arith.select %63, %64, %65 : vector<128x1xi1>, vector<128x1xf32>
    %67 = arith.addf %58, %66 : vector<128x1xf32>
    %cst_20 = arith.constant 0.000000e+00 : f32
    %68 = vector.broadcast %cst_20 : f32 to vector<128x1xf32>
    %69 = arith.cmpf olt, %61, %68 : vector<128x1xf32>
    %cst_21 = arith.constant 1.000000e+00 : f32
    %cst_22 = arith.constant 0.000000e+00 : f32
    %70 = vector.broadcast %cst_21 : f32 to vector<128x1xf32>
    %71 = vector.broadcast %cst_22 : f32 to vector<128x1xf32>
    %72 = arith.select %69, %70, %71 : vector<128x1xi1>, vector<128x1xf32>
    %73 = arith.subf %67, %72 : vector<128x1xf32>
    %74 = vector.broadcast %24 : f32 to vector<128x1xf32>
    %75 = arith.mulf %73, %74 : vector<128x1xf32>
    %76 = arith.subf %55, %75 : vector<128x1xf32>
    %77 = vector.extract_strided_slice %15 {offsets = [0, 4], sizes = [128, 1], strides = [1, 1]} : vector<128x128xf32> to vector<128x1xf32>
    %cst_23 = arith.constant 5.000000e-01 : f32
    %78 = vector.broadcast %cst_23 : f32 to vector<128x1xf32>
    %79 = arith.mulf %78, %77 : vector<128x1xf32>
    %80 = math.tanh %79 : vector<128x1xf32>
    %cst_24 = arith.constant 1.000000e+00 : f32
    %81 = vector.broadcast %cst_24 : f32 to vector<128x1xf32>
    %82 = arith.addf %80, %81 : vector<128x1xf32>
    %cst_25 = arith.constant 5.000000e-01 : f32
    %83 = vector.broadcast %cst_25 : f32 to vector<128x1xf32>
    %84 = arith.mulf %83, %82 : vector<128x1xf32>
    %85 = vector.extract_strided_slice %15 {offsets = [0, 5], sizes = [128, 1], strides = [1, 1]} : vector<128x128xf32> to vector<128x1xf32>
    %cst_26 = arith.constant 5.000000e-01 : f32
    %86 = vector.broadcast %cst_26 : f32 to vector<128x1xf32>
    %87 = arith.mulf %86, %85 : vector<128x1xf32>
    %88 = math.tanh %87 : vector<128x1xf32>
    %cst_27 = arith.constant 1.000000e+00 : f32
    %89 = vector.broadcast %cst_27 : f32 to vector<128x1xf32>
    %90 = arith.addf %88, %89 : vector<128x1xf32>
    %cst_28 = arith.constant 5.000000e-01 : f32
    %91 = vector.broadcast %cst_28 : f32 to vector<128x1xf32>
    %92 = arith.mulf %91, %90 : vector<128x1xf32>
    %93 = vector.extract_strided_slice %15 {offsets = [0, 6], sizes = [128, 1], strides = [1, 1]} : vector<128x128xf32> to vector<128x1xf32>
    %94 = math.exp %93 : vector<128x1xf32>
    %95 = vector.broadcast %30 : f32 to vector<128x1xf32>
    %96 = arith.mulf %94, %95 : vector<128x1xf32>
    %97 = vector.extract_strided_slice %15 {offsets = [0, 7], sizes = [128, 1], strides = [1, 1]} : vector<128x128xf32> to vector<128x1xf32>
    %98 = math.exp %97 : vector<128x1xf32>
    %99 = vector.broadcast %30 : f32 to vector<128x1xf32>
    %100 = arith.mulf %98, %99 : vector<128x1xf32>
    %101 = arith.addf %76, %84 : vector<128x1xf32>
    %102 = vector.broadcast %30 : f32 to vector<128x1xf32>
    %103 = arith.mulf %101, %102 : vector<128x1xf32>
    %104 = arith.addf %73, %92 : vector<128x1xf32>
    %105 = vector.broadcast %30 : f32 to vector<128x1xf32>
    %106 = arith.mulf %104, %105 : vector<128x1xf32>
    %cst_29 = arith.constant 0.000000e+00 : f32
    %107 = vector.broadcast %cst_29 : f32 to vector<128x1xf32>
    %108 = vector.broadcast %18 : f32 to vector<128x1xf32>
    %109 = arith.addf %107, %108 : vector<128x1xf32>
    %c0_30 = arith.constant 0 : index
    %c0_31 = arith.constant 0 : index
    %110 = vector.load %arg11[%c0_30, %c0_31] : memref<128x128xf32, #tpu.memory_space<vmem>>, vector<128x128xf32>
    tpu.vector_store %arg11[%c0_30, %c0_31], %15 {strides = array<i32>} : memref<128x128xf32, #tpu.memory_space<vmem>>, vector<128x128xf32>,
    %111 = tpu.concatenate %103, %106, %96, %100 in 1 : vector<128x1xf32>, vector<128x1xf32>, vector<128x1xf32>, vector<128x1xf32> -> vector<128x4xf32>
    %c0_32 = arith.constant 0 : index
    %c4 = arith.constant 4 : index
    %112 = vector.load %arg11[%c0_32, %c4] : memref<128x128xf32, #tpu.memory_space<vmem>>, vector<128x4xf32>
    tpu.vector_store %arg11[%c0_32, %c4], %111 {strides = array<i32>} : memref<128x128xf32, #tpu.memory_space<vmem>>, vector<128x4xf32>,
    %113 = tpu.concatenate %109, %73, %76 in 1 : vector<128x1xf32>, vector<128x1xf32>, vector<128x1xf32> -> vector<128x3xf32>
    %c0_33 = arith.constant 0 : index
    %c24 = arith.constant 24 : index
    %114 = vector.load %arg11[%c0_33, %c24] : memref<128x128xf32, #tpu.memory_space<vmem>>, vector<128x3xf32>
    tpu.vector_store %arg11[%c0_33, %c24], %113 {strides = array<i32>} : memref<128x128xf32, #tpu.memory_space<vmem>>, vector<128x3xf32>,
    return
  }
  func.func @transform_0(%arg0: i32, %arg1: memref<3xi32, #tpu.memory_space<smem>>, %arg2: memref<3xi32, #tpu.memory_space<smem>>, %arg3: memref<3xi32, #tpu.memory_space<smem>>, %arg4: memref<3xi32, #tpu.memory_space<smem>>, %arg5: memref<3xi32, #tpu.memory_space<smem>>) -> (i32, i32) {
    %c0_i32 = arith.constant 0 : i32
    %c0_i32_0 = arith.constant 0 : i32
    return %arg0, %c0_i32 : i32, i32
  }
  func.func @transform_1(%arg0: i32, %arg1: memref<3xi32, #tpu.memory_space<smem>>, %arg2: memref<3xi32, #tpu.memory_space<smem>>, %arg3: memref<3xi32, #tpu.memory_space<smem>>, %arg4: memref<3xi32, #tpu.memory_space<smem>>, %arg5: memref<3xi32, #tpu.memory_space<smem>>) -> (i32, i32, i32) {
    %0 = arith.index_cast %arg0 : i32 to index
    %1 = memref.load %arg1[%0] : memref<3xi32, #tpu.memory_space<smem>>
    %c0_i32 = arith.constant 0 : i32
    %c0_i32_0 = arith.constant 0 : i32
    %c0_i32_1 = arith.constant 0 : i32
    return %1, %c0_i32, %c0_i32_0 : i32, i32, i32
  }
  func.func @transform_2(%arg0: i32, %arg1: memref<3xi32, #tpu.memory_space<smem>>, %arg2: memref<3xi32, #tpu.memory_space<smem>>, %arg3: memref<3xi32, #tpu.memory_space<smem>>, %arg4: memref<3xi32, #tpu.memory_space<smem>>, %arg5: memref<3xi32, #tpu.memory_space<smem>>) -> (i32, i32, i32) {
    %0 = arith.index_cast %arg0 : i32 to index
    %1 = memref.load %arg1[%0] : memref<3xi32, #tpu.memory_space<smem>>
    %c0_i32 = arith.constant 0 : i32
    %c0_i32_0 = arith.constant 0 : i32
    %c0_i32_1 = arith.constant 0 : i32
    return %1, %c0_i32, %c0_i32_0 : i32, i32, i32
  }
  func.func @transform_3(%arg0: i32, %arg1: memref<3xi32, #tpu.memory_space<smem>>, %arg2: memref<3xi32, #tpu.memory_space<smem>>, %arg3: memref<3xi32, #tpu.memory_space<smem>>, %arg4: memref<3xi32, #tpu.memory_space<smem>>, %arg5: memref<3xi32, #tpu.memory_space<smem>>) -> (i32, i32) {
    %c0_i32 = arith.constant 0 : i32
    %c0_i32_0 = arith.constant 0 : i32
    %c0_i32_1 = arith.constant 0 : i32
    return %c0_i32, %c0_i32_0 : i32, i32
  }
  func.func @transform_4(%arg0: i32, %arg1: memref<3xi32, #tpu.memory_space<smem>>, %arg2: memref<3xi32, #tpu.memory_space<smem>>, %arg3: memref<3xi32, #tpu.memory_space<smem>>, %arg4: memref<3xi32, #tpu.memory_space<smem>>, %arg5: memref<3xi32, #tpu.memory_space<smem>>) -> (i32, i32) {
    %c0_i32 = arith.constant 0 : i32
    %c0_i32_0 = arith.constant 0 : i32
    %c0_i32_1 = arith.constant 0 : i32
    return %c0_i32, %c0_i32_0 : i32, i32
  }
  func.func @transform_5(%arg0: i32, %arg1: memref<3xi32, #tpu.memory_space<smem>>, %arg2: memref<3xi32, #tpu.memory_space<smem>>, %arg3: memref<3xi32, #tpu.memory_space<smem>>, %arg4: memref<3xi32, #tpu.memory_space<smem>>, %arg5: memref<3xi32, #tpu.memory_space<smem>>) -> (i32, i32) {
    %c0_i32 = arith.constant 0 : i32
    %c0_i32_0 = arith.constant 0 : i32
    return %arg0, %c0_i32 : i32, i32
  }
}

</mosaic_0001>

<bundles_post_ra>
// kernel: rtmdet_forward.1
= control target key start
LH: loop header
LB: loop body
LE: loop exit
PB: predicated region body
PF: predicated region fallthrough
CT: control target
= control target key end

     0   :  { %s3485_s0 = inlined_call_operand.vmem [shape: s32[3], index: 0, kind: input, shape index: {}]   ;;  %s3486_s5 = inlined_call_operand.vmem [shape: bf16[384,8], index: 5, kind: input, shape index: {}]   ;;  %s3487_s6 = inlined_call_operand.vmem [shape: bf16[3,8,128], index: 6, kind: input, shape index: {}]   ;;  %s3488_s7 = inlined_call_operand.vmem [shape: f32[3,1,128], index: 7, kind: input, shape index: {}]   ;;  %s3489_s8 = inlined_call_operand.vmem [shape: bf16[128,128], index: 8, kind: input, shape index: {}]   ;;  %s3490_s9 = inlined_call_operand.vmem [shape: f32[1,128], index: 9, kind: input, shape index: {}]   ;;  %s3491_s10 = inlined_call_operand.vmem [shape: f32[384,128], index: 10, kind: output, shape index: {}]   ;;  %s3492_s1 = inlined_call_operand.vmem [shape: s32[3], index: 1, kind: input, shape index: {}]   ;;  %s3493_s2 = inlined_call_operand.vmem [shape: s32[3], index: 2, kind: input, shape index: {}]   ;;  %s3494_s3 = inlined_call_operand.vmem [shape: s32[3], index: 3, kind: input, shape index: {}]   ;;  %s3495_s4 = inlined_call_operand.vmem [shape: s32[3], index: 4, kind: input, shape index: {}]  }
   0x1   :  { %s15_s15 = sshll.u32 %s3485_s0, 4  ;;  %s19_s18 = sshll.u32 %s3492_s1, 4  ;;  %s16_s15 = int_to_ptr.vmem [resolvable:$true] %s15_s15  ;;  %s20_s18 = int_to_ptr.vmem [resolvable:$true] %s19_s18 }
   0x2   :  { %s2071_s19 = scalar_lea.vmem %s16_s15, 16  ;;  %p2076_p1 = scmp.lt.s32.totalorder %s16_s15, %s16_s15 }
   0x3   :  { %p2072_p0 = scmp.ne.s32.totalorder %s16_s15, %s2071_s19  ;;  %p2077_p2 = scmp.lt.s32.totalorder %s2071_s19, %s2071_s19 }
   0x5   :  { %p2078_p3 = por %p2077_p2, %p2076_p1 }
   0x7   :  { %p2079_p4 = pnand %p2078_p3, %p2072_p0 }
   0x9   :  { %2082 = shalt.err (!%p2079_p4)  }
   0xa   :  { %s2141_s20 = smov [#allocation3]   ;;  %s2083_s21 = scalar_lea.vmem %s20_s18, 16 }
   0xb   :  { %18 = dma.vmem_to_smem %s16_s15, 16, %s2141_s20, [#allocation2] }
   0xc   :  { %p2084_p5 = scmp.ne.s32.totalorder %s20_s18, %s2083_s21  ;;  %p2088_p6 = scmp.lt.s32.totalorder %s20_s18, %s20_s18 }
   0xd   :  { %p2089_p7 = scmp.lt.s32.totalorder %s2083_s21, %s2083_s21 }
   0xf   :  { %p2090_p8 = por %p2089_p7, %p2088_p6 }
  0x11   :  { %p2091_p9 = pnand %p2090_p8, %p2084_p5 }
  0x13   :  { %2094 = shalt.err (!%p2091_p9)  }
  0x14   :  { %s2142_s0 = smov [#allocation4]   ;;  %s23_s23 = sshll.u32 %s3493_s2, 4  ;;  %s24_s23 = int_to_ptr.vmem [resolvable:$true] %s23_s23 }
  0x15   :  { %22 = dma.vmem_to_smem %s20_s18, 16, %s2142_s0, [#allocation2] }
  0x16   :  { %s27_s26 = sshll.u32 %s3494_s3, 4  ;;  %s2095_s27 = scalar_lea.vmem %s24_s23, 16  ;;  %s28_s26 = int_to_ptr.vmem [resolvable:$true] %s27_s26 }
  0x17   :  { %p2096_p10 = scmp.ne.s32.totalorder %s24_s23, %s2095_s27  ;;  %p2100_p11 = scmp.lt.s32.totalorder %s24_s23, %s24_s23 }
  0x18   :  { %p2101_p12 = scmp.lt.s32.totalorder %s2095_s27, %s2095_s27 }
  0x1a   :  { %p2102_p13 = por %p2101_p12, %p2100_p11 }
  0x1c   :  { %p2103_p0 = pnand %p2102_p13, %p2096_p10 }
  0x1e   :  { %2106 = shalt.err (!%p2103_p0)  }
  0x1f   :  { %s2143_s28 = smov [#allocation5]   ;;  %s2107_s29 = scalar_lea.vmem %s28_s26, 16 }
  0x20   :  { %26 = dma.vmem_to_smem %s24_s23, 16, %s2143_s28, [#allocation2] }
  0x21   :  { %p2108_p1 = scmp.ne.s32.totalorder %s28_s26, %s2107_s29  ;;  %p2112_p2 = scmp.lt.s32.totalorder %s28_s26, %s28_s26 }
  0x22   :  { %p2113_p3 = scmp.lt.s32.totalorder %s2107_s29, %s2107_s29 }
  0x24   :  { %p2114_p4 = por %p2113_p3, %p2112_p2 }
  0x26   :  { %p2115_p5 = pnand %p2114_p4, %p2108_p1 }
  0x28   :  { %2118 = shalt.err (!%p2115_p5)  }
  0x29   :  { %s2144_s2 = smov [#allocation6]   ;;  %s31_s11 = sshll.u32 %s3495_s4, 4  ;;  %s32_s11 = int_to_ptr.vmem [resolvable:$true] %s31_s11 }
  0x2a   :  { %30 = dma.vmem_to_smem %s28_s26, 16, %s2144_s2, [#allocation2] }
  0x2b   :  { %s2119_s12 = scalar_lea.vmem %s32_s11, 16  ;;  %p2124_p7 = scmp.lt.s32.totalorder %s32_s11, %s32_s11 }
  0x2c   :  { %p2120_p6 = scmp.ne.s32.totalorder %s32_s11, %s2119_s12  ;;  %p2125_p8 = scmp.lt.s32.totalorder %s2119_s12, %s2119_s12 }
  0x2e   :  { %p2126_p9 = por %p2125_p8, %p2124_p7 }
  0x30   :  { %p2127_p10 = pnand %p2126_p9, %p2120_p6 }
  0x32   :  { %2130 = shalt.err (!%p2127_p10)  }
  0x33   :  { %s2145_s13 = smov [#allocation7]  }
  0x34   :  { %34 = dma.vmem_to_smem %s32_s11, 16, %s2145_s13, [#allocation2] }
  0x35   :  { %2135 = dma.done.wait [#allocation2], 80 }
  0x36   :  { %2136 = vsyncadd [#allocation2], 4294967216 }
  0x37   :  { %36 = sfence }
  0x38   :  { %s2220_s14 = smov 0  }
  0x39 LB: > { %s2226_s4 = sadd.s32 4294967295, %s2139_s14   ;;  %p1844_p11 = scmp.ge.s32.totalorder %s2139_s14, 1  ;;  %s2139_s14 = sphi %s2220_s14, %s42_s14  }
  0x3a   : > { %p240_p12 = scmp.lt.s32.totalorder %s2139_s14, 4 }
  0x3c   : > { %p241_p13 = pnand %p1844_p11, %p240_p12 }
  0x3e   : > { %244 = sbr.rel (%p241_p13) target bundleno = 837 (0x345), region = 40 }
  0x43   : > { %s283_s15 = sld [smem:[#allocation3 + %s2226_s4]]  ;;  %s1845_s16 = sshll.u32 %s2226_s4, 4  ;;  %v1995_v0 = vld [vmem:[%s3489_s8 + $0x38] sm:$0xff]   ;;  %v1996_v1 = vld [vmem:[%s3489_s8 + $0x30] sm:$0xff]   ;;  %vm365_vm0 = vcmask 64512   ;;  %v1997_v2 = vld [vmem:[%s3489_s8 + $0x28] sm:$0xff]  }
  0x44   : > { %p278_p0 = scmp.lt.s32.totalorder %s1845_s16, 47  ;;  %1953 = vmatprep.subr.bf16.mxu1 %v1995_v0  ;;  %vm390_vm1 = vcmask 1043456   ;;  %v1998_v4 = vld [vmem:[%s3489_s8 + $0x20] sm:$0xff]   ;;  %v1999_v9 = vld [vmem:[%s3489_s8 + $0x18] sm:$0xff]   ;;  %v2000_v15 = vld [vmem:[%s3489_s8 + $0x10] sm:$0xff]   ;;  %s289_s19 = sld [smem:[#allocation3 + %s2226_s4]] }
  0x45   : > { %1961 = vmatpush3.bf16.msra.mxu1 %v1995_v0  ;;  %v2001_v16 = vld [vmem:[%s3489_s8 + $0x8] sm:$0xff]   ;;  %v2002_v17 = vld [vmem:[%s3489_s8] sm:$0xff]   ;;  %s689_s1 = sld [smem:[#allocation6 + %s2226_s4]]  ;;  %s2147_s12 = smov 124  }
  0x46   : > { %s3541_s16 = smov (!%p278_p0, %s1845_s16), 47  ;;  %1954 = vmatprep.subr.bf16.mxu1 %v1996_v1  ;;  %s685_s23 = sld [smem:[#allocation4 + %s2226_s4]] }
  0x47   : > { %s1846_s21 = sshll.u32 %s3541_s16, 2  ;;  %s2533_s27 = sld [smem:[#allocation7 + %s2226_s4]] }
  0x48   : > { %s2244_s22 = scalar_lea.vmem %s3486_s5, %s1846_s21  ;;  %s1849_s29 = sshll.u32 %s3541_s16, 3 }
  0x49   : > { %p284_p1 = scmp.lt.s32.totalorder %s283_s15, 2  ;;  %v1987_v3 = vld [vmem:[%s2244_s22] sm:$0xff]   ;;  %1962 = vmatpush3.bf16.msra.mxu1 %v1996_v1  ;;  %v1988_v7 = vld [vmem:[%s2244_s22 + $0x8] sm:$0xff]   ;;  %v1989_v8 = vld [vmem:[%s2244_s22 + $0x10] sm:$0xff]   ;;  %s2660_s11 = scalar_lea.vmem %s3491_s10, %s1849_s29 }
  0x4a   : > { %1905 = vmatprep.mubr.msk.bf16.mxu0 %vm365_vm0, %v1987_v3  ;;  %1955 = vmatprep.subr.bf16.mxu1 %v1997_v2  ;;  %v1990_v10 = vld [vmem:[%s2244_s22 + $0x18] sm:$0xff]   ;;  %v1991_v11 = vld [vmem:[%s2244_s22 + $0x20] sm:$0xff]   ;;  %v1992_v12 = vld [vmem:[%s2244_s22 + $0x28] sm:$0xff]   ;;  %p290_p2 = scmp.lt.s32.totalorder %s289_s19, 2  ;;  %s683_s13 = sld [smem:[#allocation3 + %s2226_s4]] }
  0x4b   : > { %s3543_s15 = smov (!%p284_p1, %s283_s15), 2  ;;  %v1993_v13 = vld [vmem:[%s2244_s22 + $0x30] sm:$0xff]   ;;  %v1994_v14 = vld [vmem:[%s2244_s22 + $0x38] sm:$0xff]   ;;  %s690_s22 = scvt.s32.f32 %s689_s1 }
  0x4c   : > { %s1847_s25 = sshll.u32 %s3543_s15, 2  ;;  %s3545_s19 = smov (!%p290_p2, %s289_s19), 2 }
  0x4d   : > { %s287_s28 = scalar_lea.vmem %s3487_s6, %s1847_s25  ;;  %1963 = vmatpush3.bf16.msra.mxu1 %v1997_v2  ;;  %s292_s0 = scalar_lea.vmem %s3488_s7, %s3545_s19 }
  0x4e   : > { %v317_v5 = vld [vmem:[%s287_s28] sm:$0xf]  ;;  %1956 = vmatprep.subr.bf16.mxu1 %v1998_v4  ;;  %s686_s24 = scvt.s32.f32 %s685_s23  ;;  %s687_s25 = sld [smem:[#allocation5 + %s2226_s4]] }
  0x4f   : > { %1969 = vmatprep.subr.msk.bf16.mxu0 %vm390_vm1, %v317_v5  ;;  %v392_v6 = vsel %vm390_vm1, %v317_v5, 0  ;;  %v1850_v20 = vld [vmem:[%s292_s0] ss:$0 sm:$0xff]  ;;  %s692_s28 = scvt.s32.f32 %s2533_s27  ;;  %s2148_s15 = smov 24  }
  0x50   : > { %1904 = vmatpush3.bf16.msra.mxu0 %v392_v6  ;;  %s684_s4 = scvt.s32.f32 %s683_s13  ;;  %s2149_s17 = smov 4  }
  0x51   : > { %1921 = vmatprep.subr.bf16.mxu0 %v1995_v0  ;;  %1964 = vmatpush3.bf16.msra.mxu1 %v1998_v4 }
  0x52   : > { %1957 = vmatprep.subr.bf16.mxu1 %v1999_v9 }
  0x53   : > { %1906 = vmatmul.mubr.msk.bf16.vlgmr.msra.gmra.mxu0 %vm365_vm0, %v1988_v7 }
  0x54   : > { %1909 = vmatprep.mubr.msk.bf16.mxu0 %vm365_vm0, %v1989_v8  ;;  %1922 = vmatpush3.bf16.msra.mxu0 %v1995_v0  ;;  %s688_s26 = scvt.s32.f32 %s687_s25 }
  0x55   : > { %1923 = vmatprep.subr.bf16.mxu0 %v1996_v1  ;;  %1965 = vmatpush3.bf16.msra.mxu1 %v1999_v9 }
  0x56   : > { %1958 = vmatprep.subr.bf16.mxu1 %v2000_v15 }
  0x58   : > { %1924 = vmatpush3.bf16.msra.mxu0 %v1996_v1 }
  0x59   : > { %1925 = vmatprep.subr.bf16.mxu0 %v1997_v2  ;;  %1966 = vmatpush3.bf16.msra.mxu1 %v2000_v15 }
  0x5a   : > { %1959 = vmatprep.subr.bf16.mxu1 %v2001_v16 }
  0x5b   : > { %1910 = vmatmul.mubr.msk.bf16.gmra.mxu0 %vm365_vm0, %v1990_v10 }
  0x5c   : > { %1913 = vmatprep.mubr.msk.bf16.mxu0 %vm365_vm0, %v1991_v11  ;;  %1926 = vmatpush3.bf16.msra.mxu0 %v1997_v2  ;;  %v693_v11 = vlaneseq }
  0x5d   : > { %1927 = vmatprep.subr.bf16.mxu0 %v1998_v4  ;;  %1967 = vmatpush3.bf16.msra.mxu1 %v2001_v16 }
  0x5e   : > { %1960 = vmatprep.subr.bf16.mxu1 %v2002_v17 }
  0x60   : > { %1928 = vmatpush3.bf16.msra.mxu0 %v1998_v4 }
  0x61   : > { %1929 = vmatprep.subr.bf16.mxu0 %v1999_v9  ;;  %1968 = vmatpush3.bf16.msra.mxu1 %v2002_v17 }
  0x63   : > { %1914 = vmatmul.mubr.msk.bf16.gmra.mxu0 %vm365_vm0, %v1992_v12  ;;  %v2289_v12 = vstv %s690_s22 }
  0x64   : > { %1917 = vmatprep.mubr.msk.bf16.mxu0 %vm365_vm0, %v1993_v13  ;;  %1930 = vmatpush3.bf16.msra.mxu0 %v1999_v9  ;;  %v2291_v13 = vshrl.u32 %v693_v11, 7  ;;  %2003 = vrcp.f32 %v2289_v12 }
  0x65   : > { %1931 = vmatprep.subr.bf16.mxu0 %v2000_v15 }
  0x68   : > { %1932 = vmatpush3.bf16.msra.mxu0 %v2000_v15 }
  0x69   : > { %1933 = vmatprep.subr.bf16.mxu0 %v2001_v16 }
  0x6b   : > { %1918 = vmatmul.mubr.msk.bf16.gmra.mxu0 %vm365_vm0, %v1994_v14  ;;  %v696_v14 = vadd.s32 16, %v2291_v13 }
  0x6c   : > { %1934 = vmatpush3.bf16.msra.mxu0 %v2001_v16  ;;  %v2295_v16 = vstv %s686_s24 }
  0x6d   : > { %1935 = vmatprep.subr.bf16.mxu0 %v2002_v17  ;;  %v712_v15 = vcvt.s32.f32 %v696_v14 }
  0x70   : > { %1936 = vmatpush3.bf16.msra.mxu0 %v2002_v17  ;;  %v2298_v17 = vadd.f32 %v2295_v16, %v712_v15 }
 0x113   : > { %v1907_v18 = vpop.f32.mrf.mxu0 }
 0x114   : > { %v437_v24 = vadd.f32 %v1907_v18, %v1850_v20  ;;  %v2300_v18 = vpop.eup %2003 }
 0x115   : > { %v428_v19 = vpop.f32.mrf.mxu0 }
 0x116   : > { %v429_v22 = vadd.f32 %v1850_v20, %v428_v19  ;;  %v493_v31 = vmax.f32 %v437_v24, 0.0  ;;  %v710_v19 = vcvt.s32.f32 %v2291_v13 }
 0x117   : > { %v1908_v21 = vpop.f32.mrf.mxu0 }
 0x118   : > { %v440_v23 = vadd.f32 %v1908_v21, %v1850_v20  ;;  %v491_v29 = vmax.f32 %v429_v22, 0.0  ;;  %v695_v21 = vadd.s32 8, %v2291_v13  ;;  %v747_v22 = vmul.f32 %v2300_v18, %v2298_v17 }
 0x119   : > { %v431_v25 = vpop.f32.mrf.mxu0 }
 0x11a   : > { %v432_v26 = vadd.f32 %v1850_v20, %v431_v25  ;;  %v494_v27 = vmax.f32 %v440_v23, 0.0  ;;  %v2308_v23 = vadd.f32 %v2295_v16, %v710_v19  ;;  %v711_v25 = vcvt.s32.f32 %v695_v21 }
 0x11b   : > { %v1911_v28 = vpop.f32.mrf.mxu0 }
 0x11c   : > { %v492_v30 = vmax.f32 %v432_v26, 0.0  ;;  %v453_v32 = vadd.f32 %v1911_v28, %v1850_v20  ;;  %v508_v36 = vpack.c.bf16 %v494_v27, %v493_v31  ;;  %v700_v26 = vadd.s32 48, %v2291_v13 }
 0x11d   : > { %v444_v33 = vpop.f32.mrf.mxu0  ;;  %v701_v27 = vadd.s32 56, %v2291_v13  ;;  %v763_v28 = vfloor.f32 %v747_v22  ;;  %v2319_v31 = vadd.f32 %v2295_v16, %v711_v25  ;;  %v704_v22 = vadd.s32 80, %v2291_v13 }
 0x11e   : > { %v507_v34 = vpack.c.bf16 %v492_v30, %v491_v29  ;;  %v445_v35 = vadd.f32 %v1850_v20, %v444_v33  ;;  %v497_v39 = vmax.f32 %v453_v32, 0.0  ;;  %v745_v29 = vmul.f32 %v2300_v18, %v2308_v23 }
 0x11f   : > { %v1912_v37 = vpop.f32.mrf.mxu0  ;;  %v716_v32 = vcvt.s32.f32 %v700_v26  ;;  %v717_v33 = vcvt.s32.f32 %v701_v27 }
 0x120   : > { %1937 = vmatprep.mubr.bf16.mxu0 %v507_v34  ;;  %v456_v38 = vadd.f32 %v1912_v37, %v1850_v20  ;;  %v495_v41 = vmax.f32 %v445_v35, 0.0  ;;  %v779_v34 = vmul.f32 %v763_v28, %v2289_v12  ;;  %v761_v35 = vfloor.f32 %v745_v29 }
 0x121   : > { %1938 = vmatmul.mubr.bf16.vlgmr.msra.gmra.mxu0 %v508_v36  ;;  %v447_v40 = vpop.f32.mrf.mxu0  ;;  %v746_v37 = vmul.f32 %v2300_v18, %v2319_v31 }
 0x122   : > { %v498_v42 = vmax.f32 %v456_v38, 0.0  ;;  %v448_v43 = vadd.f32 %v1850_v20, %v447_v40  ;;  %v2327_v38 = vadd.f32 %v2295_v16, %v716_v32  ;;  %v795_v40 = vsub.f32 %v2298_v17, %v779_v34 }
 0x123   : > { %v1915_v44 = vpop.f32.mrf.mxu0 }
 0x124   : > { %v496_v45 = vmax.f32 %v448_v43, 0.0  ;;  %v510_v46 = vpack.c.bf16 %v498_v42, %v497_v39  ;;  %v469_v47 = vadd.f32 %v1915_v44, %v1850_v20  ;;  %v2330_v39 = vadd.f32 %v2295_v16, %v717_v33 }
 0x125   : > { %v460_v48 = vpop.f32.mrf.mxu0  ;;  %v777_v42 = vmul.f32 %v761_v35, %v2289_v12  ;;  %v762_v44 = vfloor.f32 %v746_v37  ;;  %vm811_vm2 = vcmp.ge.f32.partialorder %v795_v40, %v2289_v12  ;;  %vm859_vm3 = vcmp.lt.f32.partialorder %v795_v40, 0.0 }
 0x126   : > { %v509_v49 = vpack.c.bf16 %v496_v45, %v495_v41  ;;  %v461_v50 = vadd.f32 %v1850_v20, %v460_v48  ;;  %v501_v53 = vmax.f32 %v469_v47, 0.0  ;;  %v698_v41 = vadd.s32 32, %v2291_v13 }
 0x127   : > { %v1916_v51 = vpop.f32.mrf.mxu0  ;;  %v2337_v45 = vmul.f32 %v2300_v18, %v2327_v38  ;;  %v699_v48 = vadd.s32 40, %v2291_v13  ;;  %v720_v37 = vcvt.s32.f32 %v704_v22 }
 0x128   : > { %1941 = vmatprep.mubr.bf16.mxu1 %v509_v49  ;;  %v472_v52 = vadd.f32 %v1916_v51, %v1850_v20  ;;  %v499_v55 = vmax.f32 %v461_v50, 0.0  ;;  %v714_v47 = vcvt.s32.f32 %v698_v41  ;;  %v2345_v49 = vstv %s688_s26 }
 0x129   : > { %1942 = vmatmul.mubr.bf16.vlgmr.msra.gmra.mxu1 %v510_v46  ;;  %v463_v54 = vpop.f32.mrf.mxu0  ;;  %v2341_v46 = vmul.f32 %v2300_v18, %v2330_v39  ;;  %v793_v50 = vsub.f32 %v2308_v23, %v777_v42  ;;  %2005 = vrcp.f32 %v2345_v49 }
 0x12a   : > { %v502_v56 = vmax.f32 %v472_v52, 0.0  ;;  %v464_v57 = vadd.f32 %v1850_v20, %v463_v54  ;;  %v3498_v52 = vmov 0.0   ;;  %v778_v54 = vmul.f32 %v762_v44, %v2289_v12 }
 0x12b   : > { %v1919_v58 = vpop.f32.mrf.mxu0  ;;  %vm809_vm4 = vcmp.ge.f32.partialorder %v793_v50, %v2289_v12  ;;  %vm857_vm6 = vcmp.lt.f32.partialorder %v793_v50, 0.0 }
 0x12c   : > { %v500_v59 = vmax.f32 %v464_v57, 0.0  ;;  %v512_v60 = vpack.c.bf16 %v502_v56, %v501_v53  ;;  %v485_v61 = vadd.f32 %v1919_v58, %v1850_v20  ;;  %v827_v53 = vsel %vm811_vm2, 1.0, %v3498_v52 }
 0x12d   : > { %v476_v62 = vpop.f32.mrf.mxu0  ;;  %v768_v56 = vfloor.f32 %v2341_v46  ;;  %v2354_v57 = vadd.f32 %v2295_v16, %v714_v47  ;;  %v715_v58 = vcvt.s32.f32 %v699_v48  ;;  %v873_v11 = vsel %vm857_vm6, 1.0, %v3498_v52 }
 0x12e   : > { %v511_v63 = vpack.c.bf16 %v500_v59, %v499_v55  ;;  %v477_v0 = vadd.f32 %v1850_v20, %v476_v62  ;;  %v505_v3 = vmax.f32 %v485_v61, 0.0  ;;  %v767_v55 = vfloor.f32 %v2337_v45 }
 0x12f   : > { %v1920_v1 = vpop.f32.mrf.mxu0  ;;  %v843_v59 = vadd.f32 %v827_v53, %v763_v28  ;;  %v875_v61 = vsel %vm859_vm3, 1.0, %v3498_v52  ;;  %v794_v62 = vsub.f32 %v2319_v31, %v778_v54  ;;  %v2411_v48 = vadd.f32 %v2295_v16, %v720_v37 }
 0x130   : > { %1945 = vmatprep.mubr.bf16.mxu1 %v511_v63  ;;  %v488_v2 = vadd.f32 %v1920_v1, %v1850_v20  ;;  %v503_v5 = vmax.f32 %v477_v0, 0.0  ;;  %v783_v63 = vmul.f32 %v767_v55, %v2289_v12  ;;  %v784_v0 = vmul.f32 %v768_v56, %v2289_v12 }
 0x131   : > { %1946 = vmatmul.mubr.bf16.gmra.mxu1 %v512_v60  ;;  %v479_v4 = vpop.f32.mrf.mxu0  ;;  %v2365_v1 = vmul.f32 %v2300_v18, %v2354_v57  ;;  %vm810_vm7 = vcmp.ge.f32.partialorder %v794_v62, %v2289_v12  ;;  %vm858_vm9 = vcmp.lt.f32.partialorder %v794_v62, 0.0 }
 0x132   : > { %v506_v6 = vmax.f32 %v488_v2, 0.0  ;;  %v480_v7 = vadd.f32 %v1850_v20, %v479_v4  ;;  %v697_v20 = vadd.s32 24, %v2291_v13  ;;  %v2368_v2 = vadd.f32 %v2295_v16, %v715_v58 }
 0x133   : > { %v825_v4 = vsel %vm809_vm4, 1.0, %v3498_v52  ;;  %v826_v14 = vsel %vm810_vm7, 1.0, %v3498_v52  ;;  %v874_v26 = vsel %vm858_vm9, 1.0, %v3498_v52 }
 0x134   : > { %v504_v8 = vmax.f32 %v480_v7, 0.0  ;;  %v514_v9 = vpack.c.bf16 %v506_v6, %v505_v3  ;;  %v713_v24 = vcvt.s32.f32 %v697_v20  ;;  %v891_v3 = vsub.f32 %v843_v59, %v875_v61 }
 0x135   : > { %v800_v6 = vsub.f32 %v2330_v39, %v784_v0  ;;  %v765_v7 = vfloor.f32 %v2365_v1  ;;  %v842_v25 = vadd.f32 %v826_v14, %v762_v44  ;;  %v2425_v59 = vmul.f32 %v2300_v18, %v2411_v48 }
 0x136   : > { %v513_v10 = vpack.c.bf16 %v504_v8, %v503_v5  ;;  %v2316_v30 = vadd.f32 %v2295_v16, %v713_v24  ;;  %v799_v5 = vsub.f32 %v2327_v38, %v783_v63  ;;  %v2378_v8 = vmul.f32 %v2300_v18, %v2368_v2  ;;  %v2393_v29 = vpop.eup %2005 }
 0x137   : > { %v907_v15 = vmul.f32 %v891_v3, %v2289_v12  ;;  %vm816_vm11 = vcmp.ge.f32.partialorder %v800_v6, %v2289_v12  ;;  %v781_v20 = vmul.f32 %v765_v7, %v2289_v12  ;;  %vm864_vm13 = vcmp.lt.f32.partialorder %v800_v6, 0.0 }
 0x138   : > { %1949 = vmatprep.mubr.bf16.mxu1 %v513_v10  ;;  %v748_v36 = vmul.f32 %v2300_v18, %v2316_v30  ;;  %v841_v10 = vadd.f32 %v825_v4, %v761_v35  ;;  %vm815_vm10 = vcmp.ge.f32.partialorder %v799_v5, %v2289_v12  ;;  %v766_v21 = vfloor.f32 %v2378_v8 }
 0x139   : > { %1950 = vmatmul.mubr.bf16.gmra.mxu1 %v514_v9  ;;  %v831_v27 = vsel %vm815_vm10, 1.0, %v3498_v52  ;;  %v832_v28 = vsel %vm816_vm11, 1.0, %v3498_v52  ;;  %v2396_v32 = vsub.f32 %v2298_v17, %v907_v15  ;;  %vm863_vm12 = vcmp.lt.f32.partialorder %v799_v5, 0.0 }
 0x13a   : > { %v764_v43 = vfloor.f32 %v748_v36  ;;  %v889_v33 = vsub.f32 %v841_v10, %v873_v11  ;;  %v797_v35 = vsub.f32 %v2354_v57, %v781_v20  ;;  %v782_v36 = vmul.f32 %v766_v21, %v2289_v12 }
 0x13b   : > { %v890_v40 = vsub.f32 %v842_v25, %v874_v26  ;;  %v847_v41 = vadd.f32 %v831_v27, %v767_v55  ;;  %v848_v42 = vadd.f32 %v832_v28, %v768_v56  ;;  %v880_v44 = vsel %vm864_vm13, 1.0, %v3498_v52 }
 0x13c   : > { %v780_v51 = vmul.f32 %v764_v43, %v2289_v12  ;;  %v2404_v17 = vmul.f32 %v2393_v29, %v2396_v32  ;;  %v905_v45 = vmul.f32 %v889_v33, %v2289_v12  ;;  %vm813_vm14 = vcmp.ge.f32.partialorder %v797_v35, %v2289_v12 }
 0x13d   : > { %v798_v47 = vsub.f32 %v2368_v2, %v782_v36  ;;  %v906_v50 = vmul.f32 %v890_v40, %v2289_v12  ;;  %v896_v53 = vsub.f32 %v848_v42, %v880_v44  ;;  %v829_v56 = vsel %vm813_vm14, 1.0, %v3498_v52 }
 0x13e   : > { %v796_v60 = vsub.f32 %v2316_v30, %v780_v51  ;;  %v957_v54 = vfloor.f32 %v2404_v17  ;;  %v2416_v55 = vsub.f32 %v2308_v23, %v905_v45  ;;  %vm861_vm15 = vcmp.lt.f32.partialorder %v797_v35, 0.0 }
 0x13f   : > { %vm814_vm0 = vcmp.ge.f32.partialorder %v798_v47, %v2289_v12  ;;  %v912_v23 = vmul.f32 %v896_v53, %v2289_v12  ;;  %v845_v62 = vadd.f32 %v829_v56, %v765_v7  ;;  %vm862_vm1 = vcmp.lt.f32.partialorder %v798_v47, 0.0 }
 0x140   : > { %vm812_vm5 = vcmp.ge.f32.partialorder %v796_v60, %v2289_v12  ;;  %vm860_vm8 = vcmp.lt.f32.partialorder %v796_v60, 0.0  ;;  %v2428_v60 = vsub.f32 %v2319_v31, %v906_v50  ;;  %v2434_v63 = vmul.f32 %v2393_v29, %v2416_v55 }
 0x141   : > { %v828_v9 = vsel %vm812_vm5, 1.0, %v3498_v52  ;;  %v876_v24 = vsel %vm860_vm8, 1.0, %v3498_v52  ;;  %v830_v0 = vsel %vm814_vm0, 1.0, %v3498_v52  ;;  %v973_v1 = vmul.f32 %v957_v54, %v2345_v49 }
 0x142   : > { %v844_v19 = vadd.f32 %v828_v9, %v764_v43  ;;  %v879_v43 = vsel %vm863_vm12, 1.0, %v3498_v52  ;;  %v771_v31 = vfloor.f32 %v2425_v59  ;;  %v2446_v4 = vmul.f32 %v2393_v29, %v2428_v60 }
 0x143   : > { %v895_v51 = vsub.f32 %v847_v41, %v879_v43  ;;  %v2452_v6 = vsub.f32 %v2330_v39, %v912_v23  ;;  %v846_v8 = vadd.f32 %v830_v0, %v766_v21  ;;  %v705_v9 = vadd.s32 88, %v2291_v13 }
 0x144   : > { %v892_v34 = vsub.f32 %v844_v19, %v876_v24  ;;  %v878_v10 = vsel %vm862_vm1, 1.0, %v3498_v52  ;;  %v989_v11 = vsub.f32 %v2396_v32, %v973_v1  ;;  %v955_v14 = vfloor.f32 %v2434_v63 }
 0x145   : > { %v911_v61 = vmul.f32 %v895_v51, %v2289_v12  ;;  %v787_v19 = vmul.f32 %v771_v31, %v2289_v12  ;;  %v2467_v20 = vmul.f32 %v2393_v29, %v2452_v6  ;;  %v894_v22 = vsub.f32 %v846_v8, %v878_v10 }
 0x146   : > { %v908_v46 = vmul.f32 %v892_v34, %v2289_v12  ;;  %v721_v24 = vcvt.s32.f32 %v705_v9  ;;  %vm1005_vm2 = vcmp.ge.f32.partialorder %v989_v11, %v2345_v49  ;;  %v971_v25 = vmul.f32 %v955_v14, %v2345_v49 }
 0x147   : > { %v2449_v5 = vsub.f32 %v2327_v38, %v911_v61  ;;  %v956_v38 = vfloor.f32 %v2446_v4  ;;  %v803_v27 = vsub.f32 %v2411_v48, %v787_v19  ;;  %v962_v34 = vfloor.f32 %v2467_v20 }
 0x148   : > { %v2420_v58 = vsub.f32 %v2316_v30, %v908_v46  ;;  %v877_v30 = vsel %vm861_vm15, 1.0, %v3498_v52  ;;  %v702_v35 = vadd.s32 64, %v2291_v13  ;;  %v910_v37 = vmul.f32 %v894_v22, %v2289_v12 }
 0x149   : > { %v893_v7 = vsub.f32 %v845_v62, %v877_v30  ;;  %v2463_v39 = vmul.f32 %v2393_v29, %v2449_v5  ;;  %v972_v28 = vmul.f32 %v956_v38, %v2345_v49  ;;  %v2489_v40 = vadd.f32 %v2295_v16, %v721_v24 }
 0x14a   : > { %v2441_v3 = vmul.f32 %v2393_v29, %v2420_v58  ;;  %v1021_v41 = vsel %vm1005_vm2, 1.0, %v3498_v52  ;;  %v987_v42 = vsub.f32 %v2416_v55, %v971_v25  ;;  %vm819_vm3 = vcmp.ge.f32.partialorder %v803_v27, %v2289_v12 }
 0x14b   : > { %v909_v21 = vmul.f32 %v893_v7, %v2289_v12  ;;  %v961_v33 = vfloor.f32 %v2463_v39  ;;  %v988_v44 = vsub.f32 %v2428_v60, %v972_v28  ;;  %v978_v17 = vmul.f32 %v962_v34, %v2345_v49 }
 0x14c   : > { %v958_v15 = vfloor.f32 %v2441_v3  ;;  %v718_v45 = vcvt.s32.f32 %v702_v35  ;;  %v2507_v47 = vsub.f32 %v2368_v2, %v910_v37  ;;  %v2511_v50 = vmul.f32 %v2300_v18, %v2489_v40 }
 0x14d   : > { %v2485_v36 = vsub.f32 %v2354_v57, %v909_v21  ;;  %v977_v57 = vmul.f32 %v961_v33, %v2345_v49  ;;  %v1037_v51 = vadd.f32 %v1021_v41, %v957_v54  ;;  %vm1053_vm4 = vcmp.lt.f32.partialorder %v989_v11, 0.0 }
 0x14e   : > { %v974_v26 = vmul.f32 %v958_v15, %v2345_v49  ;;  %v835_v53 = vsel %vm819_vm3, 1.0, %v3498_v52  ;;  %vm1003_vm5 = vcmp.ge.f32.partialorder %v987_v42, %v2345_v49  ;;  %vm867_vm7 = vcmp.lt.f32.partialorder %v803_v27, 0.0 }
 0x14f   : > { %v2504_v46 = vmul.f32 %v2393_v29, %v2485_v36  ;;  %v703_v56 = vadd.s32 72, %v2291_v13  ;;  %vm1004_vm8 = vcmp.ge.f32.partialorder %v988_v44, %v2345_v49  ;;  %v993_v2 = vsub.f32 %v2449_v5, %v977_v57 }
 0x150   : > { %v990_v43 = vsub.f32 %v2420_v58, %v974_v26  ;;  %v994_v59 = vsub.f32 %v2452_v6, %v978_v17  ;;  %v2521_v61 = vadd.f32 %v2295_v16, %v718_v45  ;;  %v2526_v23 = vmul.f32 %v2393_v29, %v2507_v47 }
 0x151   : > { %v959_v54 = vfloor.f32 %v2504_v46  ;;  %v851_v62 = vadd.f32 %v835_v53, %v771_v31  ;;  %v772_v30 = vfloor.f32 %v2511_v50  ;;  %v1069_v0 = vsel %vm1053_vm4, 1.0, %v3498_v52 }
 0x152   : > { %vm1006_vm6 = vcmp.ge.f32.partialorder %v990_v43, %v2345_v49  ;;  %v1019_v1 = vsel %vm1003_vm5, 1.0, %v3498_v52  ;;  %vm1051_vm9 = vcmp.lt.f32.partialorder %v987_v42, 0.0  ;;  %v883_v7 = vsel %vm867_vm7, 1.0, %v3498_v52 }
 0x153   : > { %v1022_v8 = vsel %vm1006_vm6, 1.0, %v3498_v52  ;;  %vm1054_vm10 = vcmp.lt.f32.partialorder %v990_v43, 0.0  ;;  %v1020_v9 = vsel %vm1004_vm8, 1.0, %v3498_v52  ;;  %v719_v10 = vcvt.s32.f32 %v703_v56 }
 0x154   : > { %vm1052_vm11 = vcmp.lt.f32.partialorder %v988_v44, 0.0  ;;  %vm1009_vm12 = vcmp.ge.f32.partialorder %v993_v2, %v2345_v49  ;;  %vm1010_vm13 = vcmp.ge.f32.partialorder %v994_v59, %v2345_v49  ;;  %v2543_v31 = vmul.f32 %v2300_v18, %v2521_v61 }
 0x155   : > { %v975_v11 = vmul.f32 %v959_v54, %v2345_v49  ;;  %v960_v19 = vfloor.f32 %v2526_v23  ;;  %v899_v21 = vsub.f32 %v851_v62, %v883_v7  ;;  %v788_v22 = vmul.f32 %v772_v30, %v2289_v12 }
 0x156   : > { %v1035_v24 = vadd.f32 %v1019_v1, %v955_v14  ;;  %v1067_v25 = vsel %vm1051_vm9, 1.0, %v3498_v52  ;;  %v1038_v26 = vadd.f32 %v1022_v8, %v958_v15  ;;  %v1070_v27 = vsel %vm1054_vm10, 1.0, %v3498_v52 }
 0x157   : > { %v1036_v28 = vadd.f32 %v1020_v9, %v956_v38  ;;  %v1025_v35 = vsel %vm1009_vm12, 1.0, %v3498_v52  ;;  %v1026_v37 = vsel %vm1010_vm13, 1.0, %v3498_v52  ;;  %v2564_v41 = vadd.f32 %v2295_v16, %v719_v10 }
 0x158   : > { %v1068_v63 = vsel %vm1052_vm11, 1.0, %v3498_v52  ;;  %vm1057_vm14 = vcmp.lt.f32.partialorder %v993_v2, 0.0  ;;  %vm1058_vm15 = vcmp.lt.f32.partialorder %v994_v59, 0.0  ;;  %v769_v3 = vfloor.f32 %v2543_v31 }
 0x159   : > { %v991_v14 = vsub.f32 %v2485_v36, %v975_v11  ;;  %v976_v4 = vmul.f32 %v960_v19, %v2345_v49  ;;  %v915_v15 = vmul.f32 %v899_v21, %v2289_v12  ;;  %v804_v38 = vsub.f32 %v2489_v40, %v788_v22 }
 0x15a   : > { %v2575_v42 = vsub.f32 %v1037_v51, %v1069_v0  ;;  %v2577_v43 = vsub.f32 %v1035_v24, %v1067_v25  ;;  %v1041_v44 = vadd.f32 %v1025_v35, %v961_v33  ;;  %v1042_v57 = vadd.f32 %v1026_v37, %v962_v34 }
 0x15b   : > { %v2584_v17 = vsub.f32 %v1038_v26, %v1070_v27  ;;  %v1073_v45 = vsel %vm1057_vm14, 1.0, %v3498_v52  ;;  %v1074_v53 = vsel %vm1058_vm15, 1.0, %v3498_v52  ;;  %v2590_v56 = vmul.f32 %v2300_v18, %v2564_v41  ;;  %v2642_v26 = vld [vmem:[%s3490_s9] ss:$0 sm:$0xff] }
 0x15c   : > { %3510 = vst [vmem:[#allocation9_spill] sm:$0xff] %v2575_v42  ;;  %3511 = vst [vmem:[#allocation10_spill] sm:$0xff] %v2577_v43  ;;  %v2592_v51 = vsub.f32 %v1036_v28, %v1068_v63  ;;  %v785_v39 = vmul.f32 %v769_v3, %v2289_v12  ;;  %vm1007_vm0 = vcmp.ge.f32.partialorder %v991_v14, %v2345_v49  ;;  %v2611_v0 = vstv %s692_s28 }
 0x15d   : > { %3512 = vst [vmem:[#allocation11_spill] sm:$0xff] %v2584_v17  ;;  %v992_v20 = vsub.f32 %v2507_v47, %v976_v4  ;;  %v2600_v33 = vsub.f32 %v2411_v48, %v915_v15  ;;  %vm820_vm1 = vcmp.ge.f32.partialorder %v804_v38, %v2289_v12  ;;  %v1101_v34 = vmul.f32 %v2575_v42, %v2345_v49 }
 0x15e   : > { %3513 = vst [vmem:[#allocation12_spill] sm:$0xff] %v2592_v51  ;;  %v1099_v2 = vmul.f32 %v2577_v43, %v2345_v49  ;;  %v2607_v59 = vsub.f32 %v1041_v44, %v1073_v45  ;;  %v2609_v62 = vsub.f32 %v1042_v57, %v1074_v53  ;;  %v1102_v1 = vmul.f32 %v2584_v17, %v2345_v49 }
 0x15f   : > { %v770_v48 = vfloor.f32 %v2590_v56  ;;  %v1100_v7 = vmul.f32 %v2592_v51, %v2345_v49  ;;  %v1023_v8 = vsel %vm1007_vm0, 1.0, %v3498_v52  ;;  %v836_v9 = vsel %vm820_vm1, 1.0, %v3498_v52 }
 0x160   : > { %v2621_v10 = vsub.f32 %v2521_v61, %v785_v39  ;;  %vm1055_vm2 = vcmp.lt.f32.partialorder %v991_v14, 0.0  ;;  %vm1008_vm3 = vcmp.ge.f32.partialorder %v992_v20, %v2345_v49  ;;  %v2626_v11 = vmul.f32 %v2393_v29, %v2600_v33 }
 0x161   : > { %vm868_vm4 = vcmp.lt.f32.partialorder %v804_v38, 0.0  ;;  %v2630_v21 = vsub.f32 %v2396_v32, %v1101_v34  ;;  %v2633_v22 = vsub.f32 %v2416_v55, %v1099_v2  ;;  %v1105_v24 = vmul.f32 %v2607_v59, %v2345_v49 }
 0x162   : > { %v1106_v25 = vmul.f32 %v2609_v62, %v2345_v49  ;;  %v1039_v27 = vadd.f32 %v1023_v8, %v959_v54  ;;  %vm1056_vm5 = vcmp.lt.f32.partialorder %v992_v20, 0.0  ;;  %v852_v32 = vadd.f32 %v836_v9, %v772_v30 }
 0x163   : > { %3514 = vst [vmem:[#allocation13_spill] sm:$0xff] %v2630_v21  ;;  %3515 = vst [vmem:[#allocation14_spill] sm:$0xff] %v2633_v22  ;;  %v786_v55 = vmul.f32 %v770_v48, %v2289_v12  ;;  %v2652_v28 = vsub.f32 %v2420_v58, %v1102_v1  ;;  %v1071_v35 = vsel %vm1055_vm2, 1.0, %v3498_v52  ;;  %v1024_v37 = vsel %vm1008_vm3, 1.0, %v3498_v52 }
 0x164   : > { %v884_v63 = vsel %vm868_vm4, 1.0, %v3498_v52  ;;  %v2663_v50 = vsub.f32 %v2428_v60, %v1100_v7  ;;  %v3497_v54 = vfloor.f32 %v2626_v11  ;;  %vm817_vm6 = vcmp.ge.f32.partialorder %v2621_v10, %v2289_v12 }
 0x165   : > { %3516 = vst [vmem:[#allocation15_spill] sm:$0xff] %v2652_v28  ;;  %v708_v58 = vadd.s32 112, %v2291_v13  ;;  %v2671_v14 = vsub.f32 %v2449_v5, %v1105_v24  ;;  %v2674_v4 = vsub.f32 %v2452_v6, %v1106_v25  ;;  %v1072_v15 = vsel %vm1056_vm5, 1.0, %v3498_v52 }
 0x166   : > { %v2678_v38 = vsub.f32 %v1039_v27, %v1071_v35  ;;  %v1040_v44 = vadd.f32 %v1024_v37, %v960_v19  ;;  %v900_v57 = vsub.f32 %v852_v32, %v884_v63  ;;  %v802_v45 = vsub.f32 %v2564_v41, %v786_v55 }
 0x167   : > { %v833_v6 = vsel %vm817_vm6, 1.0, %v3498_v52  ;;  %v981_v20 = vmul.f32 %v3497_v54, %v2345_v49  ;;  %vm865_vm7 = vcmp.lt.f32.partialorder %v2621_v10, 0.0  ;;  %v724_v23 = vcvt.s32.f32 %v708_v58 }
 0x168   : > { %v709_v19 = vadd.s32 120, %v2291_v13  ;;  %v916_v9 = vmul.f32 %v900_v57, %v2289_v12  ;;  %v849_v24 = vadd.f32 %v833_v6, %v769_v3  ;;  %vm818_vm8 = vcmp.ge.f32.partialorder %v802_v45, %v2289_v12 }
 0x169   : > { %v2699_v35 = vsub.f32 %v1040_v44, %v1072_v15  ;;  %v881_v37 = vsel %vm865_vm7, 1.0, %v3498_v52  ;;  %v2705_v31 = vadd.f32 %v2295_v16, %v724_v23  ;;  %v834_v63 = vsel %vm818_vm8, 1.0, %v3498_v52 }
 0x16a   : > { %vm866_vm9 = vcmp.lt.f32.partialorder %v802_v45, 0.0  ;;  %v706_v15 = vadd.s32 96, %v2291_v13  ;;  %v2717_v44 = vsub.f32 %v2489_v40, %v916_v9  ;;  %v897_v57 = vsub.f32 %v849_v24, %v881_v37 }
 0x16b   : > { %v850_v45 = vadd.f32 %v834_v63, %v770_v48  ;;  %v2725_v6 = vmul.f32 %v2300_v18, %v2705_v31  ;;  %v1104_v40 = vmul.f32 %v2699_v35, %v2345_v49 }
 0x16c   : > { %v722_v48 = vcvt.s32.f32 %v706_v15 }
 0x1e1   : > { %v1939_v46 = vpop.f32.mrf.mxu0 }
 0x1e2   : > { %v629_v30 = vadd.f32 %v1939_v46, %v2642_v26  ;;  %v725_v46 = vcvt.s32.f32 %v709_v19  ;;  %v707_v19 = vadd.s32 104, %v2291_v13  ;;  %v3496_v13 = vfloor.f32 %v2725_v6 }
 0x1e3   : > { %v620_v60 = vpop.f32.mrf.mxu0 }
 0x1e4   : > { %v1133_v53 = vmul.f32 0.5, %v629_v30  ;;  %v1199_v39 = vmul.f32 1.442695, %v629_v30  ;;  %1312 = vst [vmem:[%s2660_s11 + $0x10] sm:$0xff] %v629_v30  ;;  %v621_v5 = vadd.f32 %v2642_v26, %v620_v60  ;;  %v997_v30 = vsub.f32 %v2600_v33, %v981_v20 }
 0x1e5   : > { %v1940_v34 = vpop.f32.mrf.mxu0  ;;  %v882_v20 = vsel %vm866_vm9, 1.0, %v3498_v52  ;;  %v2736_v23 = vadd.f32 %v2295_v16, %v725_v46 }
 0x1e6   : > { %2007 = vtanh.f32 %v1133_v53  ;;  %v1131_v2 = vmul.f32 0.5, %v621_v5  ;;  %v1195_v1 = vmul.f32 1.442695, %v621_v5  ;;  %1310 = vst [vmem:[%s2660_s11] sm:$0xff] %v621_v5  ;;  %v632_v7 = vadd.f32 %v1940_v34, %v2642_v26 }
 0x1e7   : > { %2009 = vpow2.f32 %v1199_v39  ;;  %v623_v8 = vpop.f32.mrf.mxu0  ;;  %v1103_v5 = vmul.f32 %v2678_v38, %v2345_v49  ;;  %vm1013_vm10 = vcmp.ge.f32.partialorder %v997_v30, %v2345_v49  ;;  %vm1061_vm11 = vcmp.lt.f32.partialorder %v997_v30, 0.0 }
 0x1e8   : > { %2011 = vtanh.f32 %v1131_v2  ;;  %v1134_v25 = vmul.f32 0.5, %v632_v7  ;;  %v1201_v27 = vmul.f32 1.442695, %v632_v7  ;;  %1313 = vst [vmem:[%s2660_s11 + $0x18] sm:$0xff] %v632_v7  ;;  %v624_v32 = vadd.f32 %v2642_v26, %v623_v8 }
 0x1e9   : > { %2013 = vpow2.f32 %v1195_v1  ;;  %v1943_v55 = vpop.f32.mrf.mxu1  ;;  %v2747_v1 = vmul.f32 %v2393_v29, %v2717_v44  ;;  %v913_v7 = vmul.f32 %v897_v57, %v2289_v12  ;;  %v2751_v9 = vsub.f32 %v2485_v36, %v1103_v5 }
 0x1ea   : > { %2015 = vtanh.f32 %v1134_v25  ;;  %1311 = vst [vmem:[%s2660_s11 + $0x8] sm:$0xff] %v624_v32  ;;  %v645_v3 = vadd.f32 %v1943_v55, %v2642_v26  ;;  %v1197_v10 = vmul.f32 1.442695, %v624_v32  ;;  %v1132_v53 = vmul.f32 0.5, %v624_v32 }
 0x1eb   : > { %2017 = vpow2.f32 %v1201_v27  ;;  %v636_v58 = vpop.f32.mrf.mxu1  ;;  %v898_v24 = vsub.f32 %v850_v45, %v882_v20  ;;  %v2760_v27 = vsub.f32 %v2507_v47, %v1104_v40  ;;  %v2765_v32 = vsel %vm1013_vm10, 1.0, %v3498_v52 }
 0x1ec   : > { %1316 = vst [vmem:[%s2660_s11 + $0x30] sm:$0xff] %v645_v3  ;;  %v2714_v60 = vadd.f32 %v2642_v26, %v636_v58  ;;  %2019 = vpow2.f32 %v1197_v10  ;;  %v2769_v36 = vmul.f32 %v2300_v18, %v2736_v23  ;;  %v1137_v37 = vmul.f32 0.5, %v645_v3 }
 0x1ed   : > { %v1944_v39 = vpop.f32.mrf.mxu1  ;;  %2021 = vtanh.f32 %v1132_v53  ;;  %v2773_v46 = vsel %vm1061_vm11, 1.0, %v3498_v52  ;;  %v2776_v58 = vadd.f32 %v2295_v16, %v722_v48  ;;  %v723_v47 = vcvt.s32.f32 %v707_v19 }
 0x1ee   : > { %1314 = vst [vmem:[%s2660_s11 + $0x20] sm:$0xff] %v2714_v60  ;;  %v2730_v34 = vadd.f32 %v1944_v39, %v2642_v26  ;;  %v1207_v10 = vmul.f32 1.442695, %v645_v3  ;;  %v2782_v39 = vsub.f32 %v2521_v61, %v913_v7  ;;  %v914_v20 = vmul.f32 %v898_v24, %v2289_v12 }
 0x1ef   : > { %v639_v56 = vpop.f32.mrf.mxu1  ;;  %v791_v3 = vmul.f32 %v3496_v13, %v2289_v12  ;;  %v3500_v7 = vfloor.f32 %v2769_v36  ;;  %2023 = vtanh.f32 %v1137_v37 }
 0x1f0   : > { %1317 = vst [vmem:[%s2660_s11 + $0x38] sm:$0xff] %v2730_v34  ;;  %v2743_v2 = vadd.f32 %v2642_v26, %v639_v56  ;;  %2025 = vpow2.f32 %v1207_v10 }
 0x1f1   : > { %v1947_v8 = vpop.f32.mrf.mxu1  ;;  %v2822_v10 = vsub.f32 %v2705_v31, %v791_v3 }
 0x1f2   : > { %1315 = vst [vmem:[%s2660_s11 + $0x28] sm:$0xff] %v2743_v2  ;;  %v2757_v25 = vadd.f32 %v1947_v8, %v2642_v26 }
 0x1f3   : > { %v2008_v55 = vpop.eup %2007  ;;  %v652_v63 = vpop.f32.mrf.mxu1  ;;  %vm823_vm12 = vcmp.ge.f32.partialorder %v2822_v10, %v2289_v12  ;;  %vm871_vm13 = vcmp.lt.f32.partialorder %v2822_v10, 0.0 }
 0x1f4   : > { %v2010_v15 = vpop.eup %2009  ;;  %v1165_v57 = vadd.f32 1.0, %v2008_v55  ;;  %1320 = vst [vmem:[%s2660_s11 + $0x50] sm:$0xff] %v2757_v25  ;;  %v2786_v45 = vadd.f32 %v2642_v26, %v652_v63  ;;  %v1203_v55 = vmul.f32 1.442695, %v2714_v60  ;;  %v2802_v63 = vmul.f32 %v2300_v18, %v2776_v58 }
 0x1f5   : > { %v2012_v5 = vpop.eup %2011  ;;  %v1230_v30 = vmul.f32 %v2010_v15, %v2611_v0  ;;  %v1948_v40 = vpop.f32.mrf.mxu1  ;;  %v2805_v15 = vadd.f32 %v2295_v16, %v723_v47  ;;  %v2816_v16 = vmul.f32 %v2393_v29, %v2782_v39  ;;  %v2819_v47 = vsub.f32 %v2564_v41, %v914_v20 }
 0x1f6   : > { %v2014_v56 = vpop.eup %2013  ;;  %v1181_v48 = vmul.f32 0.5, %v1165_v57  ;;  %v1163_v19 = vadd.f32 1.0, %v2012_v5  ;;  %v2793_v61 = vadd.f32 %v1948_v40, %v2642_v26  ;;  %1318 = vst [vmem:[%s2660_s11 + $0x40] sm:$0xff] %v2786_v45  ;;  %v1138_v5 = vmul.f32 0.5, %v2730_v34 }
 0x1f7   : > { %v2016_v8 = vpop.eup %2015  ;;  %1474 = vrot.lane.b32.xlu0 %v1230_v30, %s2147_s12  ;;  %v655_v24 = vpop.f32.mrf.mxu1  ;;  %v1228_v37 = vmul.f32 %v2014_v56, %v2611_v0  ;;  %v792_v56 = vmul.f32 %v3500_v7, %v2289_v12  ;;  %2027 = vpow2.f32 %v1203_v55  ;;  %v2833_v41 = vmul.f32 %v2300_v18, %v2805_v15 }
 0x1f8   : > { %v2018_v57 = vpop.eup %2017  ;;  %v1246_v40 = vadd.f32 %v1181_v48, %v2630_v21  ;;  %1321 = vst [vmem:[%s2660_s11 + $0x58] sm:$0xff] %v2793_v61  ;;  %v1278_v13 = vadd.f32 %v1181_v48, %v2575_v42  ;;  %v1179_v54 = vmul.f32 0.5, %v1163_v19  ;;  %v1166_v52 = vadd.f32 1.0, %v2016_v8 }
 0x1f9   : > { %v1231_v30 = vmul.f32 %v2018_v57, %v2611_v0  ;;  %v1951_v53 = vpop.f32.mrf.mxu1  ;;  %v1135_v57 = vmul.f32 0.5, %v2714_v60  ;;  %2029 = vtanh.f32 %v1138_v5  ;;  %v1209_v20 = vmul.f32 1.442695, %v2730_v34  ;;  %v2020_v8 = vpop.eup %2019 }
 0x1fa   : > { %v2837_v3 = vadd.f32 %v2642_v26, %v655_v24  ;;  %v3517_v60 = vfloor.f32 %v2747_v1  ;;  %v1262_v55 = vmul.f32 %v1246_v40, %v2611_v0  ;;  %v1182_v7 = vmul.f32 0.5, %v1166_v52  ;;  %v2022_v48 = vpop.eup %2021 }
 0x1fb   : > { %1476 = vrot.lane.b32.xlu1 %v1231_v30, %s2147_s12  ;;  %1470 = vrot.lane.b32.xlu0 %v1228_v37, %s2147_s12  ;;  %v1294_v37 = vmul.f32 %v1278_v13, %v2611_v0  ;;  %v1244_v30 = vadd.f32 %v1179_v54, %v2633_v22  ;;  %v668_v18 = vpop.f32.mrf.mxu1  ;;  %v2850_v24 = vmul.f32 %v2393_v29, %v2819_v47  ;;  %2031 = vtanh.f32 %v1135_v57 }
 0x1fc   : > { %v982_v19 = vmul.f32 %v3517_v60, %v2345_v49  ;;  %1319 = vst [vmem:[%s2660_s11 + $0x48] sm:$0xff] %v2837_v3  ;;  %v2855_v5 = vsub.f32 %v2736_v23, %v792_v56  ;;  %v1136_v13 = vmul.f32 0.5, %v2743_v2  ;;  %v3518_v52 = vfloor.f32 %v2802_v63 }
 0x1fd   : > { %2033 = vpow2.f32 %v1209_v20  ;;  %v1205_v34 = vmul.f32 1.442695, %v2743_v2  ;;  %v1229_v56 = vmul.f32 %v2020_v8, %v2611_v0  ;;  %v1276_v57 = vadd.f32 %v1179_v54, %v2577_v43  ;;  %v1952_v22 = vpop.f32.mrf.mxu1 }
 0x1fe   : > { %v789_v40 = vmul.f32 %v3518_v52, %v2289_v12  ;;  %v1260_v21 = vmul.f32 %v1244_v30, %v2611_v0  ;;  %v1164_v42 = vadd.f32 1.0, %v2022_v48  ;;  %v998_v52 = vsub.f32 %v2717_v44, %v982_v19  ;;  %v2024_v19 = vpop.eup %2023 }
 0x1ff   : > { %1346 = vrot.lane.b32.xlu1 %v1262_v55, %s2147_s12  ;;  %1410 = vrot.lane.b32.xlu0 %v1294_v37, %s2147_s12  ;;  %v1247_v55 = vadd.f32 %v1182_v7, %v2652_v28  ;;  %v2870_v37 = vadd.f32 %v1951_v53, %v2642_v26  ;;  %v3519_v20 = vfloor.f32 %v2816_v16  ;;  %2035 = vtanh.f32 %v1136_v13 }
 0x200   : > { %v3520_v54 = vmov 0.0   ;;  %vm824_vm14 = vcmp.ge.f32.partialorder %v2855_v5, %v2289_v12  ;;  %v2889_v48 = vsub.f32 %v2776_v58, %v789_v40  ;;  %2037 = vpow2.f32 %v1205_v34  ;;  %v671_v34 = vpop.f32.mrf.mxu1 }
 0x201   : > { %v979_v60 = vmul.f32 %v3519_v20, %v2345_v49  ;;  %1324 = vst [vmem:[%s2660_s11 + $0x70] sm:$0xff] %v2870_v37  ;;  %v839_v53 = vsel %vm823_vm12, 1.0, %v3520_v54  ;;  %v1292_v8 = vmul.f32 %v1276_v57, %v2611_v0  ;;  %v3521_v30 = vfloor.f32 %v2833_v41 }
 0x202   : > { %v1263_v20 = vmul.f32 %v1247_v55, %v2611_v0  ;;  %v1279_v2 = vadd.f32 %v1182_v7, %v2584_v17  ;;  %v1180_v28 = vmul.f32 0.5, %v1164_v42  ;;  %v2901_v40 = vadd.f32 %v1952_v22, %v2642_v26 }
 0x203   : > { %1472 = vrot.lane.b32.xlu1 %v1229_v56, %s2147_s12  ;;  %1342 = vrot.lane.b32.xlu0 %v1260_v21, %s2147_s12  ;;  %v2893_v21 = vadd.f32 %v2642_v26, %v668_v18  ;;  %v790_v13 = vmul.f32 %v3521_v30, %v2289_v12  ;;  %v2026_v56 = vpop.eup %2025  ;;  %v3522_v57 = vfloor.f32 %v2626_v11  ;;  %vm1014_vm15 = vcmp.ge.f32.partialorder %v998_v52, %v2345_v49 }
 0x204   : > { %vm1062_vm0 = vcmp.lt.f32.partialorder %v998_v52, 0.0  ;;  %v3523_v30 = vfloor.f32 %v2725_v6  ;;  %1325 = vst [vmem:[%s2660_s11 + $0x78] sm:$0xff] %v2901_v40  ;;  %v2918_v42 = vsub.f32 %v2782_v39, %v979_v60  ;;  %v3524_v11 = vfloor.f32 %v2850_v24  ;;  %v2028_v7 = vpop.eup %2027 }
 0x205   : > { %1322 = vst [vmem:[%s2660_s11 + $0x60] sm:$0xff] %v2893_v21  ;;  %v2908_v18 = vadd.f32 %v2765_v32, %v3522_v57  ;;  %v887_v32 = vsel %vm871_vm13, 1.0, %v3520_v54  ;;  %v840_v6 = vsel %vm824_vm14, 1.0, %v3520_v54  ;;  %vm872_vm1 = vcmp.lt.f32.partialorder %v2855_v5, 0.0 }
 0x206   : > { %v855_v55 = vadd.f32 %v839_v53, %v3523_v30  ;;  %v980_v22 = vmul.f32 %v3524_v11, %v2345_v49  ;;  %v2931_v53 = vadd.f32 %v2642_v26, %v671_v34  ;;  %vm821_vm2 = vcmp.ge.f32.partialorder %v2889_v48, %v2289_v12 }
 0x207   : > { %1348 = vrot.lane.b32.xlu1 %v1263_v20, %s2147_s12  ;;  %1406 = vrot.lane.b32.xlu0 %v1292_v8, %s2147_s12  ;;  %v806_v60 = vsub.f32 %v2805_v15, %v790_v13  ;;  %v2030_v8 = vpop.eup %2029  ;;  %v1295_v10 = vmul.f32 %v1279_v2, %v2611_v0  ;;  %v1234_v20 = vmul.f32 %v2026_v56, %v2611_v0  ;;  %v1169_v30 = vadd.f32 1.0, %v2024_v19 }
 0x208   : > { %3525 = vst [vmem:[#allocation16_spill] sm:$0xff] %v2931_v53  ;;  %v1277_v57 = vadd.f32 %v1180_v28, %v2592_v51  ;;  %1323 = vst [vmem:[%s2660_s11 + $0x68] sm:$0xff] %v2931_v53  ;;  %v2945_v26 = vsel %vm1014_vm15, 1.0, %v3520_v54  ;;  %v2949_v34 = vsel %vm1062_vm0, 1.0, %v3520_v54  ;;  %v903_v13 = vsub.f32 %v855_v55, %v887_v32  ;;  %v2032_v56 = vpop.eup %2031 }
 0x209   : > { %v3526_v11 = vfloor.f32 %v2769_v36  ;;  %vm1011_vm3 = vcmp.ge.f32.partialorder %v2918_v42, %v2345_v49  ;;  %v2958_v19 = vsub.f32 %v2819_v47, %v980_v22  ;;  %v888_v52 = vsel %vm872_vm1, 1.0, %v3520_v54 }
 0x20a   : > { %v837_v36 = vsel %vm821_vm2, 1.0, %v3520_v54  ;;  %v1141_v55 = vmul.f32 0.5, %v2757_v25  ;;  %v1232_v32 = vmul.f32 %v2028_v7, %v2611_v0  ;;  %vm869_vm4 = vcmp.lt.f32.partialorder %v2889_v48, 0.0  ;;  %v2034_v22 = vpop.eup %2033 }
 0x20b   : > { %v856_v2 = vadd.f32 %v840_v6, %v3526_v11  ;;  %1412 = vrot.lane.b32.xlu1 %v1295_v10, %s2147_s12  ;;  %1482 = vrot.lane.b32.xlu0 %v1234_v20, %s2147_s12  ;;  %vm822_vm5 = vcmp.ge.f32.partialorder %v806_v60, %v2289_v12  ;;  %v1293_v6 = vmul.f32 %v1277_v57, %v2611_v0  ;;  %v1185_v10 = vmul.f32 0.5, %v1169_v30 }
 0x20c   : > { %v1245_v5 = vadd.f32 %v1180_v28, %v2663_v50  ;;  %v1170_v20 = vadd.f32 1.0, %v2030_v8  ;;  %v1027_v11 = vsel %vm1011_vm3, 1.0, %v3520_v54  ;;  %v919_v17 = vmul.f32 %v903_v13, %v2289_v12  ;;  %v2036_v8 = vpop.eup %2035 }
 0x20d   : > { %v904_v51 = vsub.f32 %v856_v2, %v888_v52  ;;  %v3527_v43 = vfloor.f32 %v2802_v63  ;;  %v1215_v7 = vmul.f32 1.442695, %v2757_v25  ;;  %vm1059_vm6 = vcmp.lt.f32.partialorder %v2918_v42, 0.0  ;;  %v2038_v57 = vpop.eup %2037 }
 0x20e   : > { %vm1012_vm7 = vcmp.ge.f32.partialorder %v2958_v19, %v2345_v49  ;;  %v885_v28 = vsel %vm869_vm4, 1.0, %v3520_v54  ;;  %vm870_vm8 = vcmp.lt.f32.partialorder %v806_v60, 0.0  ;;  %2039 = vtanh.f32 %v1141_v55 }
 0x20f   : > { %v853_v53 = vadd.f32 %v837_v36, %v3527_v43  ;;  %1408 = vrot.lane.b32.xlu1 %v1293_v6, %s2147_s12  ;;  %1478 = vrot.lane.b32.xlu0 %v1232_v32, %s2147_s12  ;;  %v1142_v43 = vmul.f32 0.5, %v2793_v61  ;;  %v1167_v63 = vadd.f32 1.0, %v2032_v56  ;;  %v838_v25 = vsel %vm822_vm5, 1.0, %v3520_v54 }
 0x210   : > { %v1235_v30 = vmul.f32 %v2034_v22, %v2611_v0  ;;  %v1261_v13 = vmul.f32 %v1245_v5, %v2611_v0  ;;  %v1250_v2 = vadd.f32 %v1185_v10, %v2671_v14  ;;  %v1186_v52 = vmul.f32 0.5, %v1170_v20 }
 0x211   : > { %v1139_v48 = vmul.f32 0.5, %v2786_v45  ;;  %v2995_v36 = vsub.f32 %v2705_v31, %v919_v17  ;;  %v920_v55 = vmul.f32 %v904_v51, %v2289_v12  ;;  %v901_v56 = vsub.f32 %v853_v53, %v885_v28 }
 0x212   : > { %2041 = vpow2.f32 %v1215_v7  ;;  %v1211_v32 = vmul.f32 1.442695, %v2786_v45  ;;  %v3528_v22 = vfloor.f32 %v2833_v41  ;;  %v886_v5 = vsel %vm870_vm8, 1.0, %v3520_v54 }
 0x213   : > { %1484 = vrot.lane.b32.xlu1 %v1235_v30, %s2147_s12  ;;  %1344 = vrot.lane.b32.xlu0 %v1261_v13, %s2147_s12  ;;  %2043 = vtanh.f32 %v1142_v43  ;;  %v1217_v17 = vmul.f32 1.442695, %v2793_v61  ;;  %v1233_v31 = vmul.f32 %v2038_v57, %v2611_v0  ;;  %v1282_v51 = vadd.f32 %v1185_v10, %v2607_v59 }
 0x214   : > { %v854_v6 = vadd.f32 %v838_v25, %v3528_v22  ;;  %v1266_v53 = vmul.f32 %v1250_v2, %v2611_v0  ;;  %v1251_v45 = vadd.f32 %v1186_v52, %v2674_v4  ;;  %v1183_v20 = vmul.f32 0.5, %v1167_v63 }
 0x215   : > { %v1168_v7 = vadd.f32 1.0, %v2036_v8  ;;  %2045 = vtanh.f32 %v1139_v48  ;;  %vm1060_vm9 = vcmp.lt.f32.partialorder %v2958_v19, 0.0  ;;  %v3013_v41 = vmul.f32 %v2393_v29, %v2995_v36 }
 0x216   : > { %v3016_v60 = vsub.f32 %v2736_v23, %v920_v55  ;;  %2047 = vpow2.f32 %v1211_v32  ;;  %v1140_v61 = vmul.f32 0.5, %v2837_v3  ;;  %v917_v10 = vmul.f32 %v901_v56, %v2289_v12 }
 0x217   : > { %1480 = vrot.lane.b32.xlu1 %v1233_v31, %s2147_s12  ;;  %1354 = vrot.lane.b32.xlu0 %v1266_v53, %s2147_s12  ;;  %v902_v28 = vsub.f32 %v854_v6, %v886_v5  ;;  %2049 = vpow2.f32 %v1217_v17  ;;  %v1213_v8 = vmul.f32 1.442695, %v2837_v3  ;;  %v1298_v43 = vmul.f32 %v1282_v51, %v2611_v0 }
 0x218   : > { %v1028_v23 = vsel %vm1012_vm7, 1.0, %v3520_v54  ;;  %v1267_v63 = vmul.f32 %v1251_v45, %v2611_v0  ;;  %v1283_v25 = vadd.f32 %v1186_v52, %v2609_v62  ;;  %v1248_v57 = vadd.f32 %v1183_v20, %v2751_v9 }
 0x219   : > { %v1184_v30 = vmul.f32 0.5, %v1168_v7  ;;  %v3529_v13 = vfloor.f32 %v2747_v1  ;;  %v3530_v3 = vfloor.f32 %v2816_v16  ;;  %v1075_v55 = vsel %vm1059_vm6, 1.0, %v3520_v54 }
 0x21a   : > { %v3041_v56 = vmul.f32 %v2393_v29, %v3016_v60  ;;  %2051 = vtanh.f32 %v1140_v61  ;;  %v969_v1 = vfloor.f32 %v3013_v41  ;;  %v918_v16 = vmul.f32 %v902_v28, %v2289_v12 }
 0x21b   : > { %v1046_v2 = vadd.f32 %v2945_v26, %v3529_v13  ;;  %v1043_v48 = vadd.f32 %v1027_v11, %v3530_v3  ;;  %1356 = vrot.lane.b32.xlu1 %v1267_v63, %s2147_s12  ;;  %1418 = vrot.lane.b32.xlu0 %v1298_v43, %s2147_s12  ;;  %v3047_v26 = vsub.f32 %v2776_v58, %v917_v10  ;;  %2053 = vpow2.f32 %v1213_v8  ;;  %v2040_v22 = vpop.eup %2039 }
 0x21c   : > { %v3052_v42 = vsub.f32 %v2908_v18, %v2773_v46  ;;  %v3531_v11 = vfloor.f32 %v2850_v24  ;;  %v1076_v32 = vsel %vm1060_vm9, 1.0, %v3520_v54  ;;  %v1299_v6 = vmul.f32 %v1283_v25, %v2611_v0 }
 0x21d   : > { %v1264_v58 = vmul.f32 %v1248_v57, %v2611_v0  ;;  %v1249_v5 = vadd.f32 %v1184_v30, %v2760_v27  ;;  %v1280_v12 = vadd.f32 %v1183_v20, %v2678_v38  ;;  %v3064_v17 = vsub.f32 %v1046_v2, %v2949_v34 }
 0x21e   : > { %v1044_v52 = vadd.f32 %v1028_v23, %v3531_v11  ;;  %v3066_v46 = vsub.f32 %v1043_v48, %v1075_v55  ;;  %v970_v24 = vfloor.f32 %v3041_v56  ;;  %v985_v18 = vmul.f32 %v969_v1, %v2345_v49 }
 0x21f   : > { %1420 = vrot.lane.b32.xlu1 %v1299_v6, %s2147_s12  ;;  %1350 = vrot.lane.b32.xlu0 %v1264_v58, %s2147_s12  ;;  %v3076_v19 = vmul.f32 %v2393_v29, %v3047_v26  ;;  %v3079_v31 = vsub.f32 %v2805_v15, %v918_v16  ;;  %v2042_v34 = vpop.eup %2041  ;;  %v1109_v51 = vmul.f32 %v3052_v42, %v2345_v49  ;;  %v1173_v10 = vadd.f32 1.0, %v2040_v22 }
 0x220   : > { %v3083_v53 = vsub.f32 %v1044_v52, %v1076_v32  ;;  %v2044_v45 = vpop.eup %2043  ;;  %v1265_v20 = vmul.f32 %v1249_v5, %v2611_v0  ;;  %v1296_v7 = vmul.f32 %v1280_v12, %v2611_v0  ;;  %v1281_v61 = vadd.f32 %v1184_v30, %v2699_v35 }
 0x221   : > { %v1110_v28 = vmul.f32 %v3064_v17, %v2345_v49  ;;  %v1107_v15 = vmul.f32 %v3066_v46, %v2345_v49  ;;  %v986_v8 = vmul.f32 %v970_v24, %v2345_v49  ;;  %v1001_v23 = vsub.f32 %v2995_v36, %v985_v18 }
 0x222   : > { %v2046_v43 = vpop.eup %2045  ;;  %v967_v63 = vfloor.f32 %v3076_v19  ;;  %v3101_v25 = vmul.f32 %v2393_v29, %v3079_v31  ;;  %v1145_v30 = vmul.f32 0.5, %v2870_v37  ;;  %v3105_v13 = vsub.f32 %v2600_v33, %v1109_v51 }
 0x223   : > { %1352 = vrot.lane.b32.xlu1 %v1265_v20, %s2147_s12  ;;  %1414 = vrot.lane.b32.xlu0 %v1296_v7, %s2147_s12  ;;  %v2048_v57 = vpop.eup %2047  ;;  %v1108_v2 = vmul.f32 %v3083_v53, %v2345_v49  ;;  %v1297_v48 = vmul.f32 %v1281_v61, %v2611_v0  ;;  %v1238_v55 = vmul.f32 %v2042_v34, %v2611_v0  ;;  %v1189_v16 = vmul.f32 0.5, %v1173_v10 }
 0x224   : > { %v2050_v3 = vpop.eup %2049  ;;  %v1174_v11 = vadd.f32 1.0, %v2044_v45  ;;  %v3112_v52 = vsub.f32 %v2717_v44, %v1110_v28  ;;  %v3115_v29 = vsub.f32 %v2782_v39, %v1107_v15  ;;  %v1002_v32 = vsub.f32 %v3016_v60, %v986_v8 }
 0x225   : > { %v1223_v33 = vmul.f32 1.442695, %v2870_v37  ;;  %vm1017_vm10 = vcmp.ge.f32.partialorder %v1001_v23, %v2345_v49  ;;  %v983_v22 = vmul.f32 %v967_v63, %v2345_v49  ;;  %v968_v44 = vfloor.f32 %v3101_v25 }
 0x226   : > { %2055 = vtanh.f32 %v1145_v30  ;;  %v1146_v39 = vmul.f32 0.5, %v2901_v40  ;;  %v1236_v58 = vmul.f32 %v2048_v57, %v2611_v0  ;;  %v3129_v37 = vsub.f32 %v2819_v47, %v1108_v2 }
 0x227   : > { %1416 = vrot.lane.b32.xlu1 %v1297_v48, %s2147_s12  ;;  %1490 = vrot.lane.b32.xlu0 %v1238_v55, %s2147_s12  ;;  %v2052_v6 = vpop.eup %2051  ;;  %v1239_v12 = vmul.f32 %v2050_v3, %v2611_v0  ;;  %v1254_v18 = vadd.f32 %v1189_v16, %v3105_v13  ;;  %v1190_v34 = vmul.f32 0.5, %v1174_v11  ;;  %v1171_v51 = vadd.f32 1.0, %v2046_v43 }
 0x228   : > { %v2054_v5 = vpop.eup %2053  ;;  %v1143_v45 = vmul.f32 0.5, %v2893_v21  ;;  %v1033_v20 = vsel %vm1017_vm10, 1.0, %v3520_v54  ;;  %vm1065_vm11 = vcmp.lt.f32.partialorder %v1001_v23, 0.0  ;;  %vm1018_vm12 = vcmp.ge.f32.partialorder %v1002_v32, %v2345_v49 }
 0x229   : > { %2057 = vpow2.f32 %v1223_v33  ;;  %v1219_v7 = vmul.f32 1.442695, %v2893_v21  ;;  %v999_v47 = vsub.f32 %v3047_v26, %v983_v22  ;;  %v984_v61 = vmul.f32 %v968_v44, %v2345_v49 }
 0x22a   : > { %2059 = vtanh.f32 %v1146_v39  ;;  %v1225_v10 = vmul.f32 1.442695, %v2901_v40  ;;  %v1237_v28 = vmul.f32 %v2054_v5, %v2611_v0  ;;  %v1172_v15 = vadd.f32 1.0, %v2052_v6  ;;  %v3532_v40 = vld [vmem:[#allocation16_spill] sm:$0xff] }
 0x22b   : > { %1492 = vrot.lane.b32.xlu1 %v1239_v12, %s2147_s12  ;;  %1486 = vrot.lane.b32.xlu0 %v1236_v58, %s2147_s12  ;;  %v1270_v8 = vmul.f32 %v1254_v18, %v2611_v0  ;;  %v1255_v21 = vadd.f32 %v1190_v34, %v3112_v52  ;;  %v1286_v43 = vadd.f32 %v1189_v16, %v3052_v42  ;;  %v1187_v57 = vmul.f32 0.5, %v1171_v51 }
 0x22c   : > { %2061 = vtanh.f32 %v1143_v45  ;;  %v1049_v30 = vadd.f32 %v1033_v20, %v969_v1  ;;  %v1081_v2 = vsel %vm1065_vm11, 1.0, %v3520_v54  ;;  %vm1066_vm13 = vcmp.lt.f32.partialorder %v1002_v32, 0.0 }
 0x22d   : > { %2063 = vpow2.f32 %v1219_v7  ;;  %v1144_v3 = vmul.f32 0.5, %v3532_v40  ;;  %v1034_v48 = vsel %vm1018_vm12, 1.0, %v3520_v54  ;;  %vm1015_vm14 = vcmp.ge.f32.partialorder %v999_v47, %v2345_v49 }
 0x22e   : > { %2065 = vpow2.f32 %v1225_v10  ;;  %v1221_v41 = vmul.f32 1.442695, %v3532_v40  ;;  %v1287_v1 = vadd.f32 %v1190_v34, %v3064_v17  ;;  %v1000_v23 = vsub.f32 %v3079_v31, %v984_v61 }
 0x22f   : > { %1488 = vrot.lane.b32.xlu1 %v1237_v28, %s2147_s12  ;;  %1362 = vrot.lane.b32.xlu0 %v1270_v8, %s2147_s12  ;;  %v1271_v55 = vmul.f32 %v1255_v21, %v2611_v0  ;;  %v1302_v16 = vmul.f32 %v1286_v43, %v2611_v0  ;;  %v1252_v11 = vadd.f32 %v1187_v57, %v3115_v29  ;;  %v1188_v33 = vmul.f32 0.5, %v1172_v15 }
 0x230   : > { %2067 = vtanh.f32 %v1144_v3  ;;  %v3167_v22 = vsub.f32 %v1049_v30, %v1081_v2  ;;  %v1050_v6 = vadd.f32 %v1034_v48, %v970_v24  ;;  %v1082_v39 = vsel %vm1066_vm13, 1.0, %v3520_v54 }
 0x231   : > { %2069 = vpow2.f32 %v1221_v41  ;;  %v1031_v58 = vsel %vm1015_vm14, 1.0, %v3520_v54  ;;  %vm1063_vm15 = vcmp.lt.f32.partialorder %v999_v47, 0.0  ;;  %vm1016_vm0 = vcmp.ge.f32.partialorder %v1000_v23, %v2345_v49 }
 0x232   : > { %v1303_v12 = vmul.f32 %v1287_v1, %v2611_v0  ;;  %v1268_v18 = vmul.f32 %v1252_v11, %v2611_v0  ;;  %v1253_v34 = vadd.f32 %v1188_v33, %v3129_v37  ;;  %v1284_v56 = vadd.f32 %v1187_v57, %v3066_v46 }
 0x233   : > { %1364 = vrot.lane.b32.xlu1 %v1271_v55, %s2147_s12  ;;  %1426 = vrot.lane.b32.xlu0 %v1302_v16, %s2147_s12  ;;  %v2056_v5 = vpop.eup %2055  ;;  %v1113_v24 = vmul.f32 %v3167_v22, %v2345_v49  ;;  %v3185_v32 = vsub.f32 %v1050_v6, %v1082_v39  ;;  %v1047_v45 = vadd.f32 %v1031_v58, %v967_v63  ;;  %v1079_v20 = vsel %vm1063_vm15, 1.0, %v3520_v54 }
 0x234   : > { %v1032_v7 = vsel %vm1016_vm0, 1.0, %v3520_v54  ;;  %vm1064_vm1 = vcmp.lt.f32.partialorder %v1000_v23, 0.0  ;;  %v1269_v61 = vmul.f32 %v1253_v34, %v2611_v0  ;;  %v1300_v10 = vmul.f32 %v1284_v56, %v2611_v0 }
 0x235   : > { %v1285_v28 = vadd.f32 %v1188_v33, %v3083_v53  ;;  %v1177_v15 = vadd.f32 1.0, %v2056_v5  ;;  %v3197_v19 = vsub.f32 %v2995_v36, %v1113_v24  ;;  %v1114_v21 = vmul.f32 %v3185_v32, %v2345_v49 }
 0x236   : > { %v2058_v51 = vpop.eup %2057  ;;  %v3201_v43 = vsub.f32 %v1047_v45, %v1079_v20  ;;  %v1048_v57 = vadd.f32 %v1032_v7, %v968_v44  ;;  %v1080_v30 = vsel %vm1064_vm1, 1.0, %v3520_v54  ;;  %vm1518_vm2 = vcmask 7168  }
 0x237   : > { %1428 = vrot.lane.b32.xlu1 %v1303_v12, %s2147_s12  ;;  %1358 = vrot.lane.b32.xlu0 %v1268_v18, %s2147_s12  ;;  %v2060_v47 = vpop.eup %2059  ;;  %v1301_v40 = vmul.f32 %v1285_v28, %v2611_v0  ;;  %v1242_v3 = vmul.f32 %v2058_v51, %v2611_v0  ;;  %v1193_v48 = vmul.f32 0.5, %v1177_v15  ;;  %v3211_v1 = vsub.f32 %v3016_v60, %v1114_v21  ;;  %v3534_v21 = vld [vmem:[#allocation14_spill] sm:$0xff] }
 0x238   : > { %v1178_v36 = vadd.f32 1.0, %v2060_v47  ;;  %v1111_v25 = vmul.f32 %v3201_v43, %v2345_v49  ;;  %v3215_v44 = vsub.f32 %v1048_v57, %v1080_v30  ;;  %vm1535_vm3 = vcmask 15360  }
 0x239   : > { %v2062_v8 = vpop.eup %2061  ;;  %v1258_v11 = vadd.f32 %v1193_v48, %v3197_v19  ;;  %v1290_v60 = vadd.f32 %v1193_v48, %v3167_v22  ;;  %vm1552_vm4 = vcmask 23552   ;;  %vm1633_vm5 = vcmask 64544  }
 0x23a   : > { %v2064_v63 = vpop.eup %2063  ;;  %v1175_v54 = vadd.f32 1.0, %v2062_v8  ;;  %v1194_v33 = vmul.f32 0.5, %v1178_v36  ;;  %v3225_v6 = vsub.f32 %v3047_v26, %v1111_v25  ;;  %v1112_v58 = vmul.f32 %v3215_v44, %v2345_v49  ;;  %v3533_v8 = vld [vmem:[#allocation10_spill] sm:$0xff]  ;;  %v3537_v36 = vld [vmem:[#allocation13_spill] sm:$0xff] }
 0x23b   : > { %1360 = vrot.lane.b32.xlu1 %v1269_v61, %s2147_s12  ;;  %1422 = vrot.lane.b32.xlu0 %v1300_v10, %s2147_s12  ;;  %v2066_v2 = vpop.eup %2065  ;;  %v1240_v16 = vmul.f32 %v2064_v63, %v2611_v0  ;;  %v1274_v12 = vmul.f32 %v1258_v11, %v2611_v0  ;;  %v1306_v56 = vmul.f32 %v1290_v60, %v2611_v0  ;;  %v3247_v61 = vstv %s684_s4 }
 0x23c   : > { %v1243_v55 = vmul.f32 %v2066_v2, %v2611_v0  ;;  %v1191_v39 = vmul.f32 0.5, %v1175_v54  ;;  %v1259_v18 = vadd.f32 %v1194_v33, %v3211_v1  ;;  %v3236_v26 = vsub.f32 %v3079_v31, %v1112_v58  ;;  %v3535_v2 = vld [vmem:[#allocation9_spill] sm:$0xff]  ;;  %v3538_v54 = vld [vmem:[#allocation11_spill] sm:$0xff] }
 0x23d   : > { %v2068_v41 = vpop.eup %2067  ;;  %v1291_v49 = vadd.f32 %v1194_v33, %v3185_v32  ;;  %v1650_v63 = vsel %vm1518_vm2, %v3247_v61, %v3533_v8  ;;  %v1658_v60 = vsel %vm1518_vm2, %v3247_v61, %v3066_v46  ;;  %v1659_v46 = vsel %vm1518_vm2, %v3247_v61, %v3083_v53 }
 0x23e   : > { %v2070_v23 = vpop.eup %2069  ;;  %v1176_v34 = vadd.f32 1.0, %v2068_v41  ;;  %v1275_v24 = vmul.f32 %v1259_v18, %v2611_v0  ;;  %v1256_v51 = vadd.f32 %v1191_v39, %v3225_v6  ;;  %v1288_v31 = vadd.f32 %v1191_v39, %v3201_v43 }
 0x23f   : > { %1424 = vrot.lane.b32.xlu1 %v1301_v40, %s2147_s12  ;;  %1498 = vrot.lane.b32.xlu0 %v1242_v3, %s2147_s12  ;;  %v1241_v5 = vmul.f32 %v2070_v23, %v2611_v0  ;;  %v1307_v20 = vmul.f32 %v1291_v49, %v2611_v0  ;;  %v1666_v57 = vsel %vm1535_vm3, %v1650_v63, %v3534_v21  ;;  %v3536_v3 = vld [vmem:[#allocation12_spill] sm:$0xff]  ;;  %vm1746_vm6 = vcmask 220352  }
 0x240   : > { %v1192_v45 = vmul.f32 0.5, %v1176_v34  ;;  %v1272_v7 = vmul.f32 %v1256_v51, %v2611_v0  ;;  %v1304_v28 = vmul.f32 %v1288_v31, %v2611_v0  ;;  %v1652_v40 = vsel %vm1518_vm2, %v3247_v61, %v3535_v2 }
 0x241   : > { %v1651_v48 = vsel %vm1518_vm2, %v3247_v61, %v3536_v3  ;;  %v1668_v41 = vsel %vm1535_vm3, %v1652_v40, %v3537_v36  ;;  %v1653_v23 = vsel %vm1518_vm2, %v3247_v61, %v3538_v54 }
 0x242   : > { %v1257_v47 = vadd.f32 %v1192_v45, %v3236_v26  ;;  %v1289_v15 = vadd.f32 %v1192_v45, %v3215_v44  ;;  %v1667_v25 = vsel %vm1535_vm3, %v1651_v48, %v2663_v50  ;;  %v1656_v50 = vsel %vm1518_vm2, %v3247_v61, %v2607_v59 }
 0x243   : > { %1500 = vrot.lane.b32.xlu1 %v1243_v55, %s2147_s12  ;;  %1494 = vrot.lane.b32.xlu0 %v1240_v16, %s2147_s12  ;;  %v3539_v16 = vld [vmem:[#allocation15_spill] sm:$0xff]  ;;  %v1672_v33 = vsel %vm1535_vm3, %v1656_v50, %v2671_v14  ;;  %v1657_v59 = vsel %vm1518_vm2, %v3247_v61, %v2609_v62 }
 0x244   : > { %v1273_v10 = vmul.f32 %v1257_v47, %v2611_v0  ;;  %v1305_v30 = vmul.f32 %v1289_v15, %v2611_v0  ;;  %v1654_v0 = vsel %vm1518_vm2, %v3247_v61, %v2678_v38  ;;  %v1669_v11 = vsel %vm1535_vm3, %v1653_v23, %v3539_v16 }
 0x245   : > { %v1670_v55 = vsel %vm1535_vm3, %v1654_v0, %v2751_v9  ;;  %v1655_v38 = vsel %vm1518_vm2, %v3247_v61, %v2699_v35  ;;  %v1674_v35 = vsel %vm1535_vm3, %v1658_v60, %v3115_v29  ;;  %v1673_v14 = vsel %vm1535_vm3, %v1657_v59, %v2674_v4 }
 0x246   : > { %v1671_v9 = vsel %vm1535_vm3, %v1655_v38, %v2760_v27  ;;  %v1660_v27 = vsel %vm1518_vm2, %v3247_v61, %v3052_v42  ;;  %v1675_v29 = vsel %vm1535_vm3, %v1659_v46, %v3129_v37  ;;  %v1662_v4 = vsel %vm1518_vm2, %v3247_v61, %v3201_v43 }
 0x247   : > { %1496 = vrot.lane.b32.xlu1 %v1241_v5, %s2147_s12  ;;  %1370 = vrot.lane.b32.xlu0 %v1274_v12, %s2147_s12  ;;  %v1676_v62 = vsel %vm1535_vm3, %v1660_v27, %v3105_v13  ;;  %v1661_v42 = vsel %vm1518_vm2, %v3247_v61, %v3064_v17  ;;  %v1678_v53 = vsel %vm1535_vm3, %v1662_v4, %v3225_v6 }
 0x248   : > { %v1677_v13 = vsel %vm1535_vm3, %v1661_v42, %v3112_v52  ;;  %v1663_v43 = vsel %vm1518_vm2, %v3247_v61, %v3215_v44 }
 0x249   : > { %v1679_v17 = vsel %vm1535_vm3, %v1663_v43, %v3236_v26 }
 0x24b   : > { %1372 = vrot.lane.b32.xlu1 %v1275_v24, %s2147_s12  ;;  %1434 = vrot.lane.b32.xlu0 %v1306_v56, %s2147_s12 }
 0x24f   : > { %1436 = vrot.lane.b32.xlu1 %v1307_v20, %s2147_s12  ;;  %1366 = vrot.lane.b32.xlu0 %v1272_v7, %s2147_s12 }
 0x253   : > { %1368 = vrot.lane.b32.xlu1 %v1273_v10, %s2147_s12  ;;  %1430 = vrot.lane.b32.xlu0 %v1304_v28, %s2147_s12 }
 0x257   : > { %1432 = vrot.lane.b32.xlu1 %v1305_v30, %s2147_s12  ;;  %1698 = vrot.lane.b32.xlu0 %v1666_v57, %s2148_s15 }
 0x25b   : > { %1702 = vrot.lane.b32.xlu0 %v1668_v41, %s2148_s15  ;;  %1700 = vrot.lane.b32.xlu1 %v1667_v25, %s2148_s15 }
 0x25f   : > { %1706 = vrot.lane.b32.xlu0 %v1670_v55, %s2148_s15  ;;  %1704 = vrot.lane.b32.xlu1 %v1669_v11, %s2148_s15 }
 0x263   : > { %1710 = vrot.lane.b32.xlu0 %v1672_v33, %s2148_s15  ;;  %1708 = vrot.lane.b32.xlu1 %v1671_v9, %s2148_s15 }
 0x267   : > { %1714 = vrot.lane.b32.xlu0 %v1674_v35, %s2148_s15  ;;  %1712 = vrot.lane.b32.xlu1 %v1673_v14, %s2148_s15 }
 0x269   : > { %v1475_v39 = vpop.permute.xlu0 %1474 }
 0x26b   : > { %1718 = vrot.lane.b32.xlu0 %v1676_v62, %s2148_s15  ;;  %1716 = vrot.lane.b32.xlu1 %v1675_v29, %s2148_s15 }
 0x26d   : > { %v1477_v37 = vpop.permute.xlu1 %1476  ;;  %v1471_v58 = vpop.permute.xlu0 %1470 }
 0x26f   : > { %1722 = vrot.lane.b32.xlu0 %v1678_v53, %s2148_s15  ;;  %1720 = vrot.lane.b32.xlu1 %v1677_v13, %s2148_s15 }
 0x271   : > { %v1347_v5 = vpop.permute.xlu1 %1346  ;;  %v1411_v12 = vpop.permute.xlu0 %1410 }
 0x272   : > { %v1521_v6 = vsel %vm1518_vm2, %v1347_v5, %v1411_v12 }
 0x273   : > { %v1538_v52 = vsel %vm1535_vm3, %v1521_v6, %v1475_v39  ;;  %1724 = vrot.lane.b32.xlu1 %v1679_v17, %s2148_s15 }
 0x274   : > { %v1555_v18 = vsel %vm1552_vm4, %v1538_v52, %v1475_v39 }
 0x275   : > { %v1473_v34 = vpop.permute.xlu1 %1472  ;;  %1589 = vrot.lane.b32.xlu0 %v1555_v18, %s2149_s17  ;;  %v1343_v44 = vpop.permute.xlu0 %1342 }
 0x279   : > { %v1349_v56 = vpop.permute.xlu1 %1348  ;;  %v1407_v24 = vpop.permute.xlu0 %1406 }
 0x27a   : > { %v1519_v26 = vsel %vm1518_vm2, %v1343_v44, %v1407_v24 }
 0x27b   : > { %v1536_v49 = vsel %vm1535_vm3, %v1519_v26, %v1471_v58 }
 0x27c   : > { %v1553_v51 = vsel %vm1552_vm4, %v1536_v49, %v1471_v58 }
 0x27d   : > { %v1413_v45 = vpop.permute.xlu1 %1412  ;;  %1585 = vrot.lane.b32.xlu0 %v1553_v51, %s2149_s17  ;;  %v1483_v20 = vpop.permute.xlu0 %1482 }
 0x27e   : > { %v1522_v7 = vsel %vm1518_vm2, %v1349_v56, %v1413_v45 }
 0x27f   : > { %v1539_v47 = vsel %vm1535_vm3, %v1522_v7, %v1477_v37 }
 0x280   : > { %v1556_v31 = vsel %vm1552_vm4, %v1539_v47, %v1477_v37 }
 0x281   : > { %1591 = vrot.lane.b32.xlu1 %v1556_v31, %s2149_s17  ;;  %v1409_v10 = vpop.permute.xlu1 %1408  ;;  %v1479_v28 = vpop.permute.xlu0 %1478 }
 0x285   : > { %v1485_v15 = vpop.permute.xlu1 %1484  ;;  %v1345_v8 = vpop.permute.xlu0 %1344 }
 0x286   : > { %v1520_v63 = vsel %vm1518_vm2, %v1345_v8, %v1409_v10 }
 0x287   : > { %v1537_v21 = vsel %vm1535_vm3, %v1520_v63, %v1473_v34 }
 0x288   : > { %v1554_v57 = vsel %vm1552_vm4, %v1537_v21, %v1473_v34 }
 0x289   : > { %v1481_v30 = vpop.permute.xlu1 %1480  ;;  %1587 = vrot.lane.b32.xlu1 %v1554_v57, %s2149_s17  ;;  %v1355_v2 = vpop.permute.xlu0 %1354 }
 0x28d   : > { %v1357_v40 = vpop.permute.xlu1 %1356  ;;  %v1419_v3 = vpop.permute.xlu0 %1418 }
 0x28e   : > { %v1525_v48 = vsel %vm1518_vm2, %v1355_v2, %v1419_v3 }
 0x28f   : > { %v1542_v36 = vsel %vm1535_vm3, %v1525_v48, %v1483_v20 }
 0x290   : > { %v1559_v41 = vsel %vm1552_vm4, %v1542_v36, %v1483_v20  ;;  %v1664_v36 = vsel %vm1518_vm2, %v3247_v61, %v3167_v22 }
 0x291   : > { %v1421_v25 = vpop.permute.xlu1 %1420  ;;  %1597 = vrot.lane.b32.xlu0 %v1559_v41, %s2149_s17  ;;  %v1351_v0 = vpop.permute.xlu0 %1350 }
 0x292   : > { %v1526_v54 = vsel %vm1518_vm2, %v1357_v40, %v1421_v25 }
 0x293   : > { %v1543_v23 = vsel %vm1535_vm3, %v1526_v54, %v1485_v15 }
 0x294   : > { %v1560_v55 = vsel %vm1552_vm4, %v1543_v23, %v1485_v15  ;;  %v1680_v23 = vsel %vm1535_vm3, %v1664_v36, %v3197_v19 }
 0x295   : > { %v1353_v16 = vpop.permute.xlu1 %1352  ;;  %1599 = vrot.lane.b32.xlu1 %v1560_v55, %s2149_s17  ;;  %v1415_v11 = vpop.permute.xlu0 %1414 }
 0x296   : > { %v1523_v50 = vsel %vm1518_vm2, %v1351_v0, %v1415_v11 }
 0x297   : > { %v1540_v38 = vsel %vm1535_vm3, %v1523_v50, %v1479_v28 }
 0x298   : > { %v1557_v33 = vsel %vm1552_vm4, %v1540_v38, %v1479_v28 }
 0x299   : > { %v1417_v9 = vpop.permute.xlu1 %1416  ;;  %1593 = vrot.lane.b32.xlu0 %v1557_v33, %s2149_s17  ;;  %v1491_v60 = vpop.permute.xlu0 %1490 }
 0x29a   : > { %v1524_v59 = vsel %vm1518_vm2, %v1353_v16, %v1417_v9  ;;  %v1665_v16 = vsel %vm1518_vm2, %v3247_v61, %v3185_v32 }
 0x29b   : > { %v1541_v35 = vsel %vm1535_vm3, %v1524_v59, %v1481_v30  ;;  %v1681_v38 = vsel %vm1535_vm3, %v1665_v16, %v3211_v1 }
 0x29c   : > { %v1558_v14 = vsel %vm1552_vm4, %v1541_v35, %v1481_v30 }
 0x29d   : > { %v1493_v27 = vpop.permute.xlu1 %1492  ;;  %1595 = vrot.lane.b32.xlu1 %v1558_v14, %s2149_s17  ;;  %v1487_v46 = vpop.permute.xlu0 %1486 }
 0x2a1   : > { %v1489_v62 = vpop.permute.xlu1 %1488  ;;  %v1363_v29 = vpop.permute.xlu0 %1362 }
 0x2a5   : > { %v1365_v39 = vpop.permute.xlu1 %1364  ;;  %v1427_v4 = vpop.permute.xlu0 %1426 }
 0x2a6   : > { %v1529_v42 = vsel %vm1518_vm2, %v1363_v29, %v1427_v4 }
 0x2a7   : > { %v1546_v53 = vsel %vm1535_vm3, %v1529_v42, %v1491_v60 }
 0x2a8   : > { %v1563_v13 = vsel %vm1552_vm4, %v1546_v53, %v1491_v60 }
 0x2a9   : > { %v1429_v37 = vpop.permute.xlu1 %1428  ;;  %1605 = vrot.lane.b32.xlu0 %v1563_v13, %s2149_s17  ;;  %v1359_v58 = vpop.permute.xlu0 %1358 }
 0x2aa   : > { %v1530_v43 = vsel %vm1518_vm2, %v1365_v39, %v1429_v37 }
 0x2ab   : > { %v1547_v17 = vsel %vm1535_vm3, %v1530_v43, %v1493_v27 }
 0x2ac   : > { %v1564_v5 = vsel %vm1552_vm4, %v1547_v17, %v1493_v27 }
 0x2ad   : > { %v1361_v12 = vpop.permute.xlu1 %1360  ;;  %1607 = vrot.lane.b32.xlu1 %v1564_v5, %s2149_s17  ;;  %v1423_v6 = vpop.permute.xlu0 %1422 }
 0x2ae   : > { %v1527_v52 = vsel %vm1518_vm2, %v1359_v58, %v1423_v6 }
 0x2af   : > { %v1544_v18 = vsel %vm1535_vm3, %v1527_v52, %v1487_v46 }
 0x2b0   : > { %v1561_v34 = vsel %vm1552_vm4, %v1544_v18, %v1487_v46 }
 0x2b1   : > { %v1425_v44 = vpop.permute.xlu1 %1424  ;;  %1601 = vrot.lane.b32.xlu0 %v1561_v34, %s2149_s17  ;;  %v1499_v56 = vpop.permute.xlu0 %1498 }
 0x2b2   : > { %v1528_v24 = vsel %vm1518_vm2, %v1361_v12, %v1425_v44 }
 0x2b3   : > { %v1545_v26 = vsel %vm1535_vm3, %v1528_v24, %v1489_v62 }
 0x2b4   : > { %v1562_v49 = vsel %vm1552_vm4, %v1545_v26, %v1489_v62 }
 0x2b5   : > { %v1501_v51 = vpop.permute.xlu1 %1500  ;;  %1603 = vrot.lane.b32.xlu1 %v1562_v49, %s2149_s17  ;;  %v1495_v45 = vpop.permute.xlu0 %1494 }
 0x2b9   : > { %v1497_v20 = vpop.permute.xlu1 %1496  ;;  %v1371_v7 = vpop.permute.xlu0 %1370 }
 0x2bd   : > { %v1373_v47 = vpop.permute.xlu1 %1372  ;;  %v1435_v31 = vpop.permute.xlu0 %1434 }
 0x2be   : > { %v1533_v10 = vsel %vm1518_vm2, %v1371_v7, %v1435_v31 }
 0x2bf   : > { %v1550_v28 = vsel %vm1535_vm3, %v1533_v10, %v1499_v56 }
 0x2c0   : > { %v1567_v15 = vsel %vm1552_vm4, %v1550_v28, %v1499_v56 }
 0x2c1   : > { %v1437_v8 = vpop.permute.xlu1 %1436  ;;  %1613 = vrot.lane.b32.xlu0 %v1567_v15, %s2149_s17  ;;  %v1367_v63 = vpop.permute.xlu0 %1366 }
 0x2c2   : > { %v1534_v21 = vsel %vm1518_vm2, %v1373_v47, %v1437_v8 }
 0x2c3   : > { %v1551_v57 = vsel %vm1535_vm3, %v1534_v21, %v1501_v51 }
 0x2c4   : > { %v1568_v30 = vsel %vm1552_vm4, %v1551_v57, %v1501_v51 }
 0x2c5   : > { %v1369_v2 = vpop.permute.xlu1 %1368  ;;  %1615 = vrot.lane.b32.xlu1 %v1568_v30, %s2149_s17  ;;  %v1431_v40 = vpop.permute.xlu0 %1430 }
 0x2c6   : > { %v1531_v3 = vsel %vm1518_vm2, %v1367_v63, %v1431_v40 }
 0x2c7   : > { %v1548_v48 = vsel %vm1535_vm3, %v1531_v3, %v1495_v45 }
 0x2c8   : > { %v1565_v41 = vsel %vm1552_vm4, %v1548_v48, %v1495_v45 }
 0x2c9   : > { %v1433_v25 = vpop.permute.xlu1 %1432  ;;  %1609 = vrot.lane.b32.xlu0 %v1565_v41, %s2149_s17  ;;  %v1699_v0 = vpop.permute.xlu0 %1698 }
 0x2ca   : > { %v1532_v54 = vsel %vm1518_vm2, %v1369_v2, %v1433_v25 }
 0x2cb   : > { %v1549_v55 = vsel %vm1535_vm3, %v1532_v54, %v1497_v20 }
 0x2cc   : > { %v1566_v11 = vsel %vm1552_vm4, %v1549_v55, %v1497_v20 }
 0x2cd   : > { %1611 = vrot.lane.b32.xlu1 %v1566_v11, %s2149_s17  ;;  %v1703_v22 = vpop.permute.xlu0 %1702  ;;  %1726 = vrot.lane.b32.xlu0 %v1680_v23, %s2148_s15  ;;  %v1701_v50 = vpop.permute.xlu1 %1700 }
 0x2d1   : > { %1728 = vrot.lane.b32.xlu1 %v1681_v38, %s2148_s15  ;;  %v1707_v19 = vpop.permute.xlu0 %1706  ;;  %v1705_v33 = vpop.permute.xlu1 %1704 }
 0x2d5   : > { %v1711_v9 = vpop.permute.xlu0 %1710  ;;  %v1709_v32 = vpop.permute.xlu1 %1708 }
 0x2d9   : > { %v1715_v61 = vpop.permute.xlu0 %1714  ;;  %v1713_v60 = vpop.permute.xlu1 %1712 }
 0x2dd   : > { %v1719_v59 = vpop.permute.xlu0 %1718  ;;  %v1717_v14 = vpop.permute.xlu1 %1716 }
 0x2e1   : > { %v1723_v35 = vpop.permute.xlu0 %1722  ;;  %v1721_v27 = vpop.permute.xlu1 %1720 }
 0x2e5   : > { %v1725_v46 = vpop.permute.xlu1 %1724 }
 0x2e7   : > { %v1590_v1 = vpop.permute.xlu0 %1589 }
 0x2e8   : > { %1636 = vst.msk [vmem:[%s2660_s11 + $0x10] sm:$0xff] %vm1633_vm5, %v1590_v1 }
 0x2e9   : > { %1749 = vst.msk [vmem:[%s2660_s11 + $0x10] sm:$0xff] %vm1746_vm6, %v1703_v22 }
 0x2ef   : > { %v1586_v62 = vpop.permute.xlu0 %1585 }
 0x2f0   : > { %1634 = vst.msk [vmem:[%s2660_s11] sm:$0xff] %vm1633_vm5, %v1586_v62 }
 0x2f1   : > { %1747 = vst.msk [vmem:[%s2660_s11] sm:$0xff] %vm1746_vm6, %v1699_v0 }
 0x2f3   : > { %v1592_v29 = vpop.permute.xlu1 %1591 }
 0x2f4   : > { %1637 = vst.msk [vmem:[%s2660_s11 + $0x18] sm:$0xff] %vm1633_vm5, %v1592_v29 }
 0x2f5   : > { %1750 = vst.msk [vmem:[%s2660_s11 + $0x18] sm:$0xff] %vm1746_vm6, %v1705_v33 }
 0x2fb   : > { %v1588_v39 = vpop.permute.xlu1 %1587 }
 0x2fc   : > { %1635 = vst.msk [vmem:[%s2660_s11 + $0x8] sm:$0xff] %vm1633_vm5, %v1588_v39 }
 0x2fd   : > { %1748 = vst.msk [vmem:[%s2660_s11 + $0x8] sm:$0xff] %vm1746_vm6, %v1701_v50 }
 0x303   : > { %v1598_v4 = vpop.permute.xlu0 %1597 }
 0x304   : > { %1640 = vst.msk [vmem:[%s2660_s11 + $0x30] sm:$0xff] %vm1633_vm5, %v1598_v4 }
 0x305   : > { %1753 = vst.msk [vmem:[%s2660_s11 + $0x30] sm:$0xff] %vm1746_vm6, %v1711_v9 }
 0x307   : > { %v1600_v42 = vpop.permute.xlu1 %1599 }
 0x308   : > { %1641 = vst.msk [vmem:[%s2660_s11 + $0x38] sm:$0xff] %vm1633_vm5, %v1600_v42 }
 0x309   : > { %1754 = vst.msk [vmem:[%s2660_s11 + $0x38] sm:$0xff] %vm1746_vm6, %v1713_v60 }
 0x30b   : > { %v1594_v53 = vpop.permute.xlu0 %1593 }
 0x30c   : > { %1638 = vst.msk [vmem:[%s2660_s11 + $0x20] sm:$0xff] %vm1633_vm5, %v1594_v53 }
 0x30d   : > { %1751 = vst.msk [vmem:[%s2660_s11 + $0x20] sm:$0xff] %vm1746_vm6, %v1707_v19 }
 0x30f   : > { %v1596_v13 = vpop.permute.xlu1 %1595 }
 0x310   : > { %1639 = vst.msk [vmem:[%s2660_s11 + $0x28] sm:$0xff] %vm1633_vm5, %v1596_v13 }
 0x311   : > { %1752 = vst.msk [vmem:[%s2660_s11 + $0x28] sm:$0xff] %vm1746_vm6, %v1709_v32 }
 0x31b   : > { %v1606_v37 = vpop.permute.xlu0 %1605 }
 0x31c   : > { %1644 = vst.msk [vmem:[%s2660_s11 + $0x50] sm:$0xff] %vm1633_vm5, %v1606_v37 }
 0x31d   : > { %1757 = vst.msk [vmem:[%s2660_s11 + $0x50] sm:$0xff] %vm1746_vm6, %v1719_v59 }
 0x31f   : > { %v1608_v58 = vpop.permute.xlu1 %1607 }
 0x320   : > { %1645 = vst.msk [vmem:[%s2660_s11 + $0x58] sm:$0xff] %vm1633_vm5, %v1608_v58 }
 0x321   : > { %1758 = vst.msk [vmem:[%s2660_s11 + $0x58] sm:$0xff] %vm1746_vm6, %v1721_v27 }
 0x323   : > { %v1602_v43 = vpop.permute.xlu0 %1601 }
 0x324   : > { %1642 = vst.msk [vmem:[%s2660_s11 + $0x40] sm:$0xff] %vm1633_vm5, %v1602_v43 }
 0x325   : > { %1755 = vst.msk [vmem:[%s2660_s11 + $0x40] sm:$0xff] %vm1746_vm6, %v1715_v61 }
 0x327   : > { %v1604_v17 = vpop.permute.xlu1 %1603 }
 0x328   : > { %1643 = vst.msk [vmem:[%s2660_s11 + $0x48] sm:$0xff] %vm1633_vm5, %v1604_v17 }
 0x329   : > { %1756 = vst.msk [vmem:[%s2660_s11 + $0x48] sm:$0xff] %vm1746_vm6, %v1717_v14 }
 0x333   : > { %v1614_v5 = vpop.permute.xlu0 %1613 }
 0x334   : > { %1648 = vst.msk [vmem:[%s2660_s11 + $0x70] sm:$0xff] %vm1633_vm5, %v1614_v5 }
 0x337   : > { %v1616_v12 = vpop.permute.xlu1 %1615 }
 0x338   : > { %1649 = vst.msk [vmem:[%s2660_s11 + $0x78] sm:$0xff] %vm1633_vm5, %v1616_v12 }
 0x33b   : > { %v1610_v6 = vpop.permute.xlu0 %1609 }
 0x33c   : > { %1646 = vst.msk [vmem:[%s2660_s11 + $0x60] sm:$0xff] %vm1633_vm5, %v1610_v6 }
 0x33d   : > { %1759 = vst.msk [vmem:[%s2660_s11 + $0x60] sm:$0xff] %vm1746_vm6, %v1723_v35 }
 0x33f   : > { %v1612_v52 = vpop.permute.xlu1 %1611  ;;  %v1727_v18 = vpop.permute.xlu0 %1726 }
 0x340   : > { %1647 = vst.msk [vmem:[%s2660_s11 + $0x68] sm:$0xff] %vm1633_vm5, %v1612_v52 }
 0x341   : > { %1761 = vst.msk [vmem:[%s2660_s11 + $0x70] sm:$0xff] %vm1746_vm6, %v1727_v18  ;;  %1760 = vst.msk [vmem:[%s2660_s11 + $0x68] sm:$0xff] %vm1746_vm6, %v1725_v46 }
 0x343   : > { %v1729_v34 = vpop.permute.xlu1 %1728 }
 0x344   : > { %1762 = vst.msk [vmem:[%s2660_s11 + $0x78] sm:$0xff] %vm1746_vm6, %v1729_v34 }
 0x345 PF: > { %s42_s14 = sadd.s32 1, %s2139_s14  }
 0x346   : > { %p39_p3 = scmp.ge.s32.totalorder %s42_s14, 5  }
 0x348   :  { %41 = sbr.rel (!%p39_p3) target bundleno = 57 (0x39), region = 76 }

</bundles_post_ra>
